<compile_context>
chip_gen: v7x
topology: tpu7x:2x2x1
jax: 0.10.0
libtpu: 0.0.40
codegen_flags: <defaults>
</compile_context>

<pallas_src>
import jax
import jax.numpy as jnp
from jax.experimental import pallas as pl
from jax.experimental.pallas import tpu as pltpu


# ----------------------------------------------------------------------------
# Fused forward kernel
# ----------------------------------------------------------------------------
def make_tvae_kernel(B, T, latent_dim, enc_struct, dec_struct):
    """enc_struct / dec_struct: tuple of (dilation, same_ch) per TemporalBlock."""
    N = B * T
    f32 = jnp.float32

    def kernel(*refs):
        in_refs = refs[:-3]
        xrec_ref, mu_ref, ls_ref = refs[-3:]
        it = iter(in_refs)

        x_ref = next(it)
        eps_ref = next(it)

        # Per-sequence time index (built once, reused by every block / conv).
        t_idx = jax.lax.broadcasted_iota(jnp.int32, (N, 1), 0) % T

        def temporal_block(h, dilation, same_ch):
            w1, b1, w2, b2 = next(it), next(it), next(it), next(it)
            wd = bd = None
            if not same_ch:
                wd, bd = next(it), next(it)
            # Rows whose shifted read would cross a sequence start are zeroed
            # (this reproduces the left-pad + chomp of the causal conv).
            mask = (t_idx >= dilation).astype(f32)

            def causal_conv_k2(v, w_ref, b_ref):
                # shifted[n] = v[n - dilation] within each sequence, else 0.
                # pltpu.roll runs on the XLU (pure data movement, no MXU flops).
                v_prev = pltpu.roll(v, shift=dilation, axis=0) * mask
                return (jnp.dot(v_prev, w_ref[0], preferred_element_type=f32)
                        + jnp.dot(v, w_ref[1], preferred_element_type=f32)
                        + b_ref[...])

            h1 = jnp.maximum(causal_conv_k2(h, w1, b1), 0.0)
            h2 = jnp.maximum(causal_conv_k2(h1, w2, b2), 0.0)
            if same_ch:
                res = h                                               # identity residual
            else:
                res = jnp.dot(h, wd[...], preferred_element_type=f32) + bd[...]
            return jnp.maximum(h2 + res, 0.0)

        # ---- encoder TCN ----
        h = x_ref[...].astype(f32)
        for dilation, same_ch in enc_struct:
            h = temporal_block(h, dilation, same_ch)

        # ---- mu & log_sigma as ONE fused matmul, then reparameterization ----
        muls_w, muls_b = next(it), next(it)
        muls = jnp.dot(h, muls_w[...], preferred_element_type=f32) + muls_b[...]
        mu = muls[:, :latent_dim]
        log_sigma = muls[:, latent_dim:]
        z = mu + eps_ref[...] * jnp.exp(log_sigma * 0.5)

        # ---- decoder fc + decoder TCN ----
        dec_w, dec_b = next(it), next(it)
        d = jnp.dot(z, dec_w[...], preferred_element_type=f32) + dec_b[...]
        for dilation, same_ch in dec_struct:
            d = temporal_block(d, dilation, same_ch)

        # ---- outputs (sigmoid fused into the epilogue) ----
        xrec_ref[...] = jax.nn.sigmoid(d)     # (N, 1); decoder ends at 1 channel
        mu_ref[...] = mu
        ls_ref[...] = log_sigma

    return kernel


# ----------------------------------------------------------------------------
# Forward wrapper (single pallas_call)
# ----------------------------------------------------------------------------
def tvae_forward(params, x, eps):
    B, T = x.shape
    latent_dim = params["mu_w"].shape[1]
    N = B * T

    enc_struct = tuple((s["dilation"], s["same_ch"]) for _, s in params["enc_blocks"])
    dec_struct = tuple((s["dilation"], s["same_ch"]) for _, s in params["dec_blocks"])

    inputs = [x.reshape(N, 1).astype(jnp.float32),
              eps.reshape(N, latent_dim).astype(jnp.float32)]

    def add_blocks(blocks):
        for blk, static in blocks:
            inputs.extend([blk["w1"], blk["b1"], blk["w2"], blk["b2"]])
            if not static["same_ch"]:          # skip unused downsample weights
                inputs.extend([blk["wd"], blk["bd"]])

    add_blocks(params["enc_blocks"])
    # mu and log_sigma share one MXU matmul inside the kernel.
    inputs.append(jnp.concatenate([params["mu_w"], params["ls_w"]], axis=1))
    inputs.append(jnp.concatenate([params["mu_b"], params["ls_b"]], axis=1))
    inputs.extend([params["dec_w"], params["dec_b"]])
    add_blocks(params["dec_blocks"])

    kern = make_tvae_kernel(B, T, latent_dim, enc_struct, dec_struct)
    x_rec2, mu2, ls2 = pl.pallas_call(
        kern,
        out_shape=(
            jax.ShapeDtypeStruct((N, 1), jnp.float32),
            jax.ShapeDtypeStruct((N, latent_dim), jnp.float32),
            jax.ShapeDtypeStruct((N, latent_dim), jnp.float32),
        ),
    )(*inputs)

    return (x_rec2.reshape(B, T),
            mu2.reshape(B, T, latent_dim),
            ls2.reshape(B, T, latent_dim))


# ----------------------------------------------------------------------------
# Parameter construction (deterministic, synthetic)
# ----------------------------------------------------------------------------
def init_tcn_params(key, num_inputs, num_channels, kernel_size=2, scale=0.3):
    blocks = []
    cin = num_inputs
    for i, cout in enumerate(num_channels):
        key, k1, k2, k3, k4, k5, k6 = jax.random.split(key, 7)
        same = (cin == cout)
        blk = dict(
            w1=scale * jax.random.normal(k1, (kernel_size, cin, cout), jnp.float32),
            b1=0.1 * jax.random.normal(k2, (1, cout), jnp.float32),
            w2=scale * jax.random.normal(k3, (kernel_size, cout, cout), jnp.float32),
            b2=0.1 * jax.random.normal(k4, (1, cout), jnp.float32),
            wd=None if same else scale * jax.random.normal(k5, (cin, cout), jnp.float32),
            bd=None if same else 0.1 * jax.random.normal(k6, (1, cout), jnp.float32),
        )
        static = dict(dilation=2 ** i, same_ch=same)
        blocks.append((blk, static))
        cin = cout
    return key, blocks


def init_tvae_params(key, input_dim, num_channels, latent_dim):
    key, enc_blocks = init_tcn_params(key, input_dim, num_channels)
    key, dec_blocks = init_tcn_params(key, num_channels[-1], num_channels[::-1])
    c_last = num_channels[-1]
    key, k1, k2, k3, k4, k5, k6 = jax.random.split(key, 7)
    return dict(
        enc_blocks=enc_blocks,
        dec_blocks=dec_blocks,
        mu_w=0.3 * jax.random.normal(k1, (c_last, latent_dim), jnp.float32),
        mu_b=0.1 * jax.random.normal(k2, (1, latent_dim), jnp.float32),
        ls_w=0.3 * jax.random.normal(k3, (c_last, latent_dim), jnp.float32),
        ls_b=0.1 * jax.random.normal(k4, (1, latent_dim), jnp.float32),
        dec_w=0.3 * jax.random.normal(k5, (latent_dim, c_last), jnp.float32),
        dec_b=0.1 * jax.random.normal(k6, (1, c_last), jnp.float32),
    )


# ----------------------------------------------------------------------------
# Pure-JAX reference (correctness sanity check)
# ----------------------------------------------------------------------------
def tvae_reference(params, x, eps):
    B, T = x.shape

    def tcn(h, blocks):
        for blk, static in blocks:
            d = static["dilation"]

            def conv(v, w, b):
                v_prev = jnp.pad(v, ((0, 0), (d, 0), (0, 0)))[:, :T, :]
                return v_prev @ w[0] + v @ w[1] + b

            h1 = jnp.maximum(conv(h, blk["w1"], blk["b1"]), 0.0)
            h2 = jnp.maximum(conv(h1, blk["w2"], blk["b2"]), 0.0)
            res = h if static["same_ch"] else h @ blk["wd"] + blk["bd"]
            h = jnp.maximum(h2 + res, 0.0)
        return h

    h = tcn(x.reshape(B, T, 1), params["enc_blocks"])
    mu = h @ params["mu_w"] + params["mu_b"]
    ls = h @ params["ls_w"] + params["ls_b"]
    z = mu + eps * jnp.exp(ls * 0.5)
    d = z @ params["dec_w"] + params["dec_b"]
    d = tcn(d, params["dec_blocks"])
    return jax.nn.sigmoid(d.reshape(B, T)), mu, ls


# ----------------------------------------------------------------------------
if __name__ == "__main__":
    # Small, module-consistent shapes:
    #   batch B=2, sequence T=16, input_dim=1 (univariate series),
    #   num_channels=[1, 8, 16] (first must be 1 so decode() reshape is valid),
    #   latent_dim=4.
    B, T = 2, 16
    input_dim = 1
    num_channels = [1, 8, 16]
    latent_dim = 4

    root = jax.random.PRNGKey(0)
    k_params, k_x, k_eps = jax.random.split(root, 3)

    params = init_tvae_params(k_params, input_dim, num_channels, latent_dim)
    x = jax.random.uniform(k_x, (B, T), jnp.float32)          # values in [0,1) like BCE targets
    eps = jax.random.normal(k_eps, (B, T, latent_dim), jnp.float32)

    x_refactor, mu, log_sigma = tvae_forward(params, x, eps)
    jax.block_until_ready((x_refactor, mu, log_sigma))

    assert x_refactor.shape == (B, T)
    assert mu.shape == (B, T, latent_dim)
    assert log_sigma.shape == (B, T, latent_dim)
    assert bool(jnp.all(jnp.isfinite(x_refactor)))
    assert bool(jnp.all(jnp.isfinite(mu)))
    assert bool(jnp.all(jnp.isfinite(log_sigma)))

    # Sanity check against a pure-JAX reference (loose tolerance: MXU default
    # f32 matmul precision differs slightly from the XLA reference path).
    with jax.default_matmul_precision("float32"):
        ref_x, ref_mu, ref_ls = tvae_reference(params, x, eps)
    assert bool(jnp.allclose(x_refactor, ref_x, rtol=5e-2, atol=5e-2))
    assert bool(jnp.allclose(mu, ref_mu, rtol=5e-2, atol=5e-2))
    assert bool(jnp.allclose(log_sigma, ref_ls, rtol=5e-2, atol=5e-2))

    print("KERNEL_OK")
</pallas_src>

<mosaic_0001>
module attributes {stable_mosaic.version = 11 : i64} {
  func.func @kernel(%arg0: memref<32x1xf32, #tpu.memory_space<vmem>>, %arg1: memref<32x4xf32, #tpu.memory_space<vmem>>, %arg2: memref<2x1x1xf32, #tpu.memory_space<vmem>>, %arg3: memref<1x1xf32, #tpu.memory_space<vmem>>, %arg4: memref<2x1x1xf32, #tpu.memory_space<vmem>>, %arg5: memref<1x1xf32, #tpu.memory_space<vmem>>, %arg6: memref<2x1x8xf32, #tpu.memory_space<vmem>>, %arg7: memref<1x8xf32, #tpu.memory_space<vmem>>, %arg8: memref<2x8x8xf32, #tpu.memory_space<vmem>>, %arg9: memref<1x8xf32, #tpu.memory_space<vmem>>, %arg10: memref<1x8xf32, #tpu.memory_space<vmem>>, %arg11: memref<1x8xf32, #tpu.memory_space<vmem>>, %arg12: memref<2x8x16xf32, #tpu.memory_space<vmem>>, %arg13: memref<1x16xf32, #tpu.memory_space<vmem>>, %arg14: memref<2x16x16xf32, #tpu.memory_space<vmem>>, %arg15: memref<1x16xf32, #tpu.memory_space<vmem>>, %arg16: memref<8x16xf32, #tpu.memory_space<vmem>>, %arg17: memref<1x16xf32, #tpu.memory_space<vmem>>, %arg18: memref<16x8xf32, #tpu.memory_space<vmem>>, %arg19: memref<1x8xf32, #tpu.memory_space<vmem>>, %arg20: memref<4x16xf32, #tpu.memory_space<vmem>>, %arg21: memref<1x16xf32, #tpu.memory_space<vmem>>, %arg22: memref<2x16x16xf32, #tpu.memory_space<vmem>>, %arg23: memref<1x16xf32, #tpu.memory_space<vmem>>, %arg24: memref<2x16x16xf32, #tpu.memory_space<vmem>>, %arg25: memref<1x16xf32, #tpu.memory_space<vmem>>, %arg26: memref<2x16x8xf32, #tpu.memory_space<vmem>>, %arg27: memref<1x8xf32, #tpu.memory_space<vmem>>, %arg28: memref<2x8x8xf32, #tpu.memory_space<vmem>>, %arg29: memref<1x8xf32, #tpu.memory_space<vmem>>, %arg30: memref<16x8xf32, #tpu.memory_space<vmem>>, %arg31: memref<1x8xf32, #tpu.memory_space<vmem>>, %arg32: memref<2x8x1xf32, #tpu.memory_space<vmem>>, %arg33: memref<1x1xf32, #tpu.memory_space<vmem>>, %arg34: memref<2x1x1xf32, #tpu.memory_space<vmem>>, %arg35: memref<1x1xf32, #tpu.memory_space<vmem>>, %arg36: memref<8x1xf32, #tpu.memory_space<vmem>>, %arg37: memref<1x1xf32, #tpu.memory_space<vmem>>, %arg38: memref<32x1xf32, #tpu.memory_space<vmem>>, %arg39: memref<32x4xf32, #tpu.memory_space<vmem>>, %arg40: memref<32x4xf32, #tpu.memory_space<vmem>>) attributes {dimension_semantics = [], scalar_prefetch = 0 : i64, scratch_operands = 0 : i64, tpu.core_type = #tpu.core_type<tc>} {
    %0 = tpu.iota {dimensions = array<i32: 0>} : vector<32x1xi32>
    %c16_i32 = arith.constant 16 : i32
    %c0_i32 = arith.constant 0 : i32
    %1 = arith.cmpi eq, %c16_i32, %c0_i32 : i32
    %c1_i32 = arith.constant 1 : i32
    %2 = arith.select %1, %c1_i32, %c16_i32 : i32
    %3 = vector.broadcast %2 : i32 to vector<32x1xi32>
    %4 = arith.remsi %0, %3 : vector<32x1xi32>
    %c0_i32_0 = arith.constant 0 : i32
    %5 = vector.broadcast %c0_i32_0 : i32 to vector<32x1xi32>
    %6 = arith.cmpi ne, %4, %5 : vector<32x1xi32>
    %c0_i32_1 = arith.constant 0 : i32
    %7 = vector.broadcast %c0_i32_1 : i32 to vector<32x1xi32>
    %8 = arith.cmpi slt, %4, %7 : vector<32x1xi32>
    %c0_i32_2 = arith.constant 0 : i32
    %9 = arith.cmpi slt, %2, %c0_i32_2 : i32
    %10 = vector.broadcast %9 : i1 to vector<32x1xi1>
    %11 = vector.broadcast %10 : vector<32x1xi1> to vector<32x1xi1>
    %12 = arith.xori %8, %11 : vector<32x1xi1>
    %13 = arith.andi %12, %6 : vector<32x1xi1>
    %14 = vector.broadcast %2 : i32 to vector<32x1xi32>
    %15 = arith.addi %4, %14 : vector<32x1xi32>
    %16 = arith.select %13, %15, %4 : vector<32x1xi1>, vector<32x1xi32>
    %c0 = arith.constant 0 : index
    %c0_3 = arith.constant 0 : index
    %17 = vector.load %arg0[%c0, %c0_3] : memref<32x1xf32, #tpu.memory_space<vmem>>, vector<32x1xf32>
    %c1_i32_4 = arith.constant 1 : i32
    %18 = vector.broadcast %c1_i32_4 : i32 to vector<32x1xi32>
    %19 = arith.cmpi sge, %16, %18 : vector<32x1xi32>
    %20 = arith.extui %19 : vector<32x1xi1> to vector<32x1xi32>
    %21 = arith.sitofp %20 : vector<32x1xi32> to vector<32x1xf32>
    %c1_i32_5 = arith.constant 1 : i32
    %22 = tpu.dynamic_rotate %17 by %c1_i32_5 dim 0 : vector<32x1xf32>, i32 -> vector<32x1xf32>
    %23 = arith.mulf %22, %21 : vector<32x1xf32>
    %c0_6 = arith.constant 0 : index
    %c0_7 = arith.constant 0 : index
    %c0_8 = arith.constant 0 : index
    %24 = vector.load %arg2[%c0_6, %c0_7, %c0_8] : memref<2x1x1xf32, #tpu.memory_space<vmem>>, vector<1x1x1xf32>
    %25 = vector.shape_cast %24 : vector<1x1x1xf32> to vector<1x1xf32>
    %cst = arith.constant dense<0.000000e+00> : vector<32x1xf32>
    %26 = tpu.matmul %23, %25, %cst {dimension_numbers = #tpu.dot_dimension_numbers<[1], [0], [0], [1], [0, 0, 1, 1], [], []>} : vector<32x1xf32>, vector<1x1xf32>, vector<32x1xf32> -> vector<32x1xf32>
    %c1 = arith.constant 1 : index
    %c0_9 = arith.constant 0 : index
    %c0_10 = arith.constant 0 : index
    %27 = vector.load %arg2[%c1, %c0_9, %c0_10] : memref<2x1x1xf32, #tpu.memory_space<vmem>>, vector<1x1x1xf32>
    %28 = vector.shape_cast %27 : vector<1x1x1xf32> to vector<1x1xf32>
    %cst_11 = arith.constant dense<0.000000e+00> : vector<32x1xf32>
    %29 = tpu.matmul %17, %28, %cst_11 {dimension_numbers = #tpu.dot_dimension_numbers<[1], [0], [0], [1], [0, 0, 1, 1], [], []>} : vector<32x1xf32>, vector<1x1xf32>, vector<32x1xf32> -> vector<32x1xf32>
    %30 = arith.addf %26, %29 : vector<32x1xf32>
    %c0_12 = arith.constant 0 : index
    %c0_13 = arith.constant 0 : index
    %31 = vector.load %arg3[%c0_12, %c0_13] : memref<1x1xf32, #tpu.memory_space<vmem>>, vector<1x1xf32>
    %32 = vector.broadcast %31 : vector<1x1xf32> to vector<32x1xf32>
    %33 = arith.addf %30, %32 : vector<32x1xf32>
    %cst_14 = arith.constant 0.000000e+00 : f32
    %34 = vector.broadcast %cst_14 : f32 to vector<32x1xf32>
    %35 = arith.maximumf %33, %34 : vector<32x1xf32>
    %c1_i32_15 = arith.constant 1 : i32
    %36 = tpu.dynamic_rotate %35 by %c1_i32_15 dim 0 : vector<32x1xf32>, i32 -> vector<32x1xf32>
    %37 = arith.mulf %36, %21 : vector<32x1xf32>
    %c0_16 = arith.constant 0 : index
    %c0_17 = arith.constant 0 : index
    %c0_18 = arith.constant 0 : index
    %38 = vector.load %arg4[%c0_16, %c0_17, %c0_18] : memref<2x1x1xf32, #tpu.memory_space<vmem>>, vector<1x1x1xf32>
    %39 = vector.shape_cast %38 : vector<1x1x1xf32> to vector<1x1xf32>
    %cst_19 = arith.constant dense<0.000000e+00> : vector<32x1xf32>
    %40 = tpu.matmul %37, %39, %cst_19 {dimension_numbers = #tpu.dot_dimension_numbers<[1], [0], [0], [1], [0, 0, 1, 1], [], []>} : vector<32x1xf32>, vector<1x1xf32>, vector<32x1xf32> -> vector<32x1xf32>
    %c1_20 = arith.constant 1 : index
    %c0_21 = arith.constant 0 : index
    %c0_22 = arith.constant 0 : index
    %41 = vector.load %arg4[%c1_20, %c0_21, %c0_22] : memref<2x1x1xf32, #tpu.memory_space<vmem>>, vector<1x1x1xf32>
    %42 = vector.shape_cast %41 : vector<1x1x1xf32> to vector<1x1xf32>
    %cst_23 = arith.constant dense<0.000000e+00> : vector<32x1xf32>
    %43 = tpu.matmul %35, %42, %cst_23 {dimension_numbers = #tpu.dot_dimension_numbers<[1], [0], [0], [1], [0, 0, 1, 1], [], []>} : vector<32x1xf32>, vector<1x1xf32>, vector<32x1xf32> -> vector<32x1xf32>
    %44 = arith.addf %40, %43 : vector<32x1xf32>
    %c0_24 = arith.constant 0 : index
    %c0_25 = arith.constant 0 : index
    %45 = vector.load %arg5[%c0_24, %c0_25] : memref<1x1xf32, #tpu.memory_space<vmem>>, vector<1x1xf32>
    %46 = vector.broadcast %45 : vector<1x1xf32> to vector<32x1xf32>
    %47 = arith.addf %44, %46 : vector<32x1xf32>
    %cst_26 = arith.constant 0.000000e+00 : f32
    %48 = vector.broadcast %cst_26 : f32 to vector<32x1xf32>
    %49 = arith.maximumf %47, %48 : vector<32x1xf32>
    %50 = arith.addf %49, %17 : vector<32x1xf32>
    %cst_27 = arith.constant 0.000000e+00 : f32
    %51 = vector.broadcast %cst_27 : f32 to vector<32x1xf32>
    %52 = arith.maximumf %50, %51 : vector<32x1xf32>
    %c2_i32 = arith.constant 2 : i32
    %53 = vector.broadcast %c2_i32 : i32 to vector<32x1xi32>
    %54 = arith.cmpi sge, %16, %53 : vector<32x1xi32>
    %55 = arith.extui %54 : vector<32x1xi1> to vector<32x1xi32>
    %56 = arith.sitofp %55 : vector<32x1xi32> to vector<32x1xf32>
    %c2_i32_28 = arith.constant 2 : i32
    %57 = tpu.dynamic_rotate %52 by %c2_i32_28 dim 0 : vector<32x1xf32>, i32 -> vector<32x1xf32>
    %58 = arith.mulf %57, %56 : vector<32x1xf32>
    %c0_29 = arith.constant 0 : index
    %c0_30 = arith.constant 0 : index
    %c0_31 = arith.constant 0 : index
    %59 = vector.load %arg6[%c0_29, %c0_30, %c0_31] : memref<2x1x8xf32, #tpu.memory_space<vmem>>, vector<1x1x8xf32>
    %60 = vector.shape_cast %59 : vector<1x1x8xf32> to vector<1x8xf32>
    %cst_32 = arith.constant dense<0.000000e+00> : vector<32x8xf32>
    %61 = tpu.matmul %58, %60, %cst_32 {dimension_numbers = #tpu.dot_dimension_numbers<[1], [0], [0], [1], [0, 0, 1, 1], [], []>} : vector<32x1xf32>, vector<1x8xf32>, vector<32x8xf32> -> vector<32x8xf32>
    %c1_33 = arith.constant 1 : index
    %c0_34 = arith.constant 0 : index
    %c0_35 = arith.constant 0 : index
    %62 = vector.load %arg6[%c1_33, %c0_34, %c0_35] : memref<2x1x8xf32, #tpu.memory_space<vmem>>, vector<1x1x8xf32>
    %63 = vector.shape_cast %62 : vector<1x1x8xf32> to vector<1x8xf32>
    %cst_36 = arith.constant dense<0.000000e+00> : vector<32x8xf32>
    %64 = tpu.matmul %52, %63, %cst_36 {dimension_numbers = #tpu.dot_dimension_numbers<[1], [0], [0], [1], [0, 0, 1, 1], [], []>} : vector<32x1xf32>, vector<1x8xf32>, vector<32x8xf32> -> vector<32x8xf32>
    %65 = arith.addf %61, %64 : vector<32x8xf32>
    %c0_37 = arith.constant 0 : index
    %c0_38 = arith.constant 0 : index
    %66 = vector.load %arg7[%c0_37, %c0_38] : memref<1x8xf32, #tpu.memory_space<vmem>>, vector<1x8xf32>
    %67 = vector.broadcast %66 : vector<1x8xf32> to vector<32x8xf32>
    %68 = arith.addf %65, %67 : vector<32x8xf32>
    %cst_39 = arith.constant 0.000000e+00 : f32
    %69 = vector.broadcast %cst_39 : f32 to vector<32x8xf32>
    %70 = arith.maximumf %68, %69 : vector<32x8xf32>
    %c2_i32_40 = arith.constant 2 : i32
    %71 = tpu.dynamic_rotate %70 by %c2_i32_40 dim 0 : vector<32x8xf32>, i32 -> vector<32x8xf32>
    %72 = vector.broadcast %56 : vector<32x1xf32> to vector<32x8xf32>
    %73 = arith.mulf %71, %72 : vector<32x8xf32>
    %c0_41 = arith.constant 0 : index
    %c0_42 = arith.constant 0 : index
    %c0_43 = arith.constant 0 : index
    %74 = vector.load %arg8[%c0_41, %c0_42, %c0_43] : memref<2x8x8xf32, #tpu.memory_space<vmem>>, vector<1x8x8xf32>
    %75 = vector.shape_cast %74 : vector<1x8x8xf32> to vector<8x8xf32>
    %cst_44 = arith.constant dense<0.000000e+00> : vector<32x8xf32>
    %76 = tpu.matmul %73, %75, %cst_44 {dimension_numbers = #tpu.dot_dimension_numbers<[1], [0], [0], [1], [0, 0, 1, 1], [], []>} : vector<32x8xf32>, vector<8x8xf32>, vector<32x8xf32> -> vector<32x8xf32>
    %c1_45 = arith.constant 1 : index
    %c0_46 = arith.constant 0 : index
    %c0_47 = arith.constant 0 : index
    %77 = vector.load %arg8[%c1_45, %c0_46, %c0_47] : memref<2x8x8xf32, #tpu.memory_space<vmem>>, vector<1x8x8xf32>
    %78 = vector.shape_cast %77 : vector<1x8x8xf32> to vector<8x8xf32>
    %cst_48 = arith.constant dense<0.000000e+00> : vector<32x8xf32>
    %79 = tpu.matmul %70, %78, %cst_48 {dimension_numbers = #tpu.dot_dimension_numbers<[1], [0], [0], [1], [0, 0, 1, 1], [], []>} : vector<32x8xf32>, vector<8x8xf32>, vector<32x8xf32> -> vector<32x8xf32>
    %80 = arith.addf %76, %79 : vector<32x8xf32>
    %c0_49 = arith.constant 0 : index
    %c0_50 = arith.constant 0 : index
    %81 = vector.load %arg9[%c0_49, %c0_50] : memref<1x8xf32, #tpu.memory_space<vmem>>, vector<1x8xf32>
    %82 = vector.broadcast %81 : vector<1x8xf32> to vector<32x8xf32>
    %83 = arith.addf %80, %82 : vector<32x8xf32>
    %cst_51 = arith.constant 0.000000e+00 : f32
    %84 = vector.broadcast %cst_51 : f32 to vector<32x8xf32>
    %85 = arith.maximumf %83, %84 : vector<32x8xf32>
    %c0_52 = arith.constant 0 : index
    %c0_53 = arith.constant 0 : index
    %86 = vector.load %arg10[%c0_52, %c0_53] : memref<1x8xf32, #tpu.memory_space<vmem>>, vector<1x8xf32>
    %cst_54 = arith.constant dense<0.000000e+00> : vector<32x8xf32>
    %87 = tpu.matmul %52, %86, %cst_54 {dimension_numbers = #tpu.dot_dimension_numbers<[1], [0], [0], [1], [0, 0, 1, 1], [], []>} : vector<32x1xf32>, vector<1x8xf32>, vector<32x8xf32> -> vector<32x8xf32>
    %c0_55 = arith.constant 0 : index
    %c0_56 = arith.constant 0 : index
    %88 = vector.load %arg11[%c0_55, %c0_56] : memref<1x8xf32, #tpu.memory_space<vmem>>, vector<1x8xf32>
    %89 = vector.broadcast %88 : vector<1x8xf32> to vector<32x8xf32>
    %90 = arith.addf %87, %89 : vector<32x8xf32>
    %91 = arith.addf %85, %90 : vector<32x8xf32>
    %cst_57 = arith.constant 0.000000e+00 : f32
    %92 = vector.broadcast %cst_57 : f32 to vector<32x8xf32>
    %93 = arith.maximumf %91, %92 : vector<32x8xf32>
    %c4_i32 = arith.constant 4 : i32
    %94 = vector.broadcast %c4_i32 : i32 to vector<32x1xi32>
    %95 = arith.cmpi sge, %16, %94 : vector<32x1xi32>
    %96 = arith.extui %95 : vector<32x1xi1> to vector<32x1xi32>
    %97 = arith.sitofp %96 : vector<32x1xi32> to vector<32x1xf32>
    %c4_i32_58 = arith.constant 4 : i32
    %98 = tpu.dynamic_rotate %93 by %c4_i32_58 dim 0 : vector<32x8xf32>, i32 -> vector<32x8xf32>
    %99 = vector.broadcast %97 : vector<32x1xf32> to vector<32x8xf32>
    %100 = arith.mulf %98, %99 : vector<32x8xf32>
    %c0_59 = arith.constant 0 : index
    %c0_60 = arith.constant 0 : index
    %c0_61 = arith.constant 0 : index
    %101 = vector.load %arg12[%c0_59, %c0_60, %c0_61] : memref<2x8x16xf32, #tpu.memory_space<vmem>>, vector<1x8x16xf32>
    %102 = vector.shape_cast %101 : vector<1x8x16xf32> to vector<8x16xf32>
    %cst_62 = arith.constant dense<0.000000e+00> : vector<32x16xf32>
    %103 = tpu.matmul %100, %102, %cst_62 {dimension_numbers = #tpu.dot_dimension_numbers<[1], [0], [0], [1], [0, 0, 1, 1], [], []>} : vector<32x8xf32>, vector<8x16xf32>, vector<32x16xf32> -> vector<32x16xf32>
    %c1_63 = arith.constant 1 : index
    %c0_64 = arith.constant 0 : index
    %c0_65 = arith.constant 0 : index
    %104 = vector.load %arg12[%c1_63, %c0_64, %c0_65] : memref<2x8x16xf32, #tpu.memory_space<vmem>>, vector<1x8x16xf32>
    %105 = vector.shape_cast %104 : vector<1x8x16xf32> to vector<8x16xf32>
    %cst_66 = arith.constant dense<0.000000e+00> : vector<32x16xf32>
    %106 = tpu.matmul %93, %105, %cst_66 {dimension_numbers = #tpu.dot_dimension_numbers<[1], [0], [0], [1], [0, 0, 1, 1], [], []>} : vector<32x8xf32>, vector<8x16xf32>, vector<32x16xf32> -> vector<32x16xf32>
    %107 = arith.addf %103, %106 : vector<32x16xf32>
    %c0_67 = arith.constant 0 : index
    %c0_68 = arith.constant 0 : index
    %108 = vector.load %arg13[%c0_67, %c0_68] : memref<1x16xf32, #tpu.memory_space<vmem>>, vector<1x16xf32>
    %109 = vector.broadcast %108 : vector<1x16xf32> to vector<32x16xf32>
    %110 = arith.addf %107, %109 : vector<32x16xf32>
    %cst_69 = arith.constant 0.000000e+00 : f32
    %111 = vector.broadcast %cst_69 : f32 to vector<32x16xf32>
    %112 = arith.maximumf %110, %111 : vector<32x16xf32>
    %c4_i32_70 = arith.constant 4 : i32
    %113 = tpu.dynamic_rotate %112 by %c4_i32_70 dim 0 : vector<32x16xf32>, i32 -> vector<32x16xf32>
    %114 = vector.broadcast %97 : vector<32x1xf32> to vector<32x16xf32>
    %115 = arith.mulf %113, %114 : vector<32x16xf32>
    %c0_71 = arith.constant 0 : index
    %c0_72 = arith.constant 0 : index
    %c0_73 = arith.constant 0 : index
    %116 = vector.load %arg14[%c0_71, %c0_72, %c0_73] : memref<2x16x16xf32, #tpu.memory_space<vmem>>, vector<1x16x16xf32>
    %117 = vector.shape_cast %116 : vector<1x16x16xf32> to vector<16x16xf32>
    %cst_74 = arith.constant dense<0.000000e+00> : vector<32x16xf32>
    %118 = tpu.matmul %115, %117, %cst_74 {dimension_numbers = #tpu.dot_dimension_numbers<[1], [0], [0], [1], [0, 0, 1, 1], [], []>} : vector<32x16xf32>, vector<16x16xf32>, vector<32x16xf32> -> vector<32x16xf32>
    %c1_75 = arith.constant 1 : index
    %c0_76 = arith.constant 0 : index
    %c0_77 = arith.constant 0 : index
    %119 = vector.load %arg14[%c1_75, %c0_76, %c0_77] : memref<2x16x16xf32, #tpu.memory_space<vmem>>, vector<1x16x16xf32>
    %120 = vector.shape_cast %119 : vector<1x16x16xf32> to vector<16x16xf32>
    %cst_78 = arith.constant dense<0.000000e+00> : vector<32x16xf32>
    %121 = tpu.matmul %112, %120, %cst_78 {dimension_numbers = #tpu.dot_dimension_numbers<[1], [0], [0], [1], [0, 0, 1, 1], [], []>} : vector<32x16xf32>, vector<16x16xf32>, vector<32x16xf32> -> vector<32x16xf32>
    %122 = arith.addf %118, %121 : vector<32x16xf32>
    %c0_79 = arith.constant 0 : index
    %c0_80 = arith.constant 0 : index
    %123 = vector.load %arg15[%c0_79, %c0_80] : memref<1x16xf32, #tpu.memory_space<vmem>>, vector<1x16xf32>
    %124 = vector.broadcast %123 : vector<1x16xf32> to vector<32x16xf32>
    %125 = arith.addf %122, %124 : vector<32x16xf32>
    %cst_81 = arith.constant 0.000000e+00 : f32
    %126 = vector.broadcast %cst_81 : f32 to vector<32x16xf32>
    %127 = arith.maximumf %125, %126 : vector<32x16xf32>
    %c0_82 = arith.constant 0 : index
    %c0_83 = arith.constant 0 : index
    %128 = vector.load %arg16[%c0_82, %c0_83] : memref<8x16xf32, #tpu.memory_space<vmem>>, vector<8x16xf32>
    %cst_84 = arith.constant dense<0.000000e+00> : vector<32x16xf32>
    %129 = tpu.matmul %93, %128, %cst_84 {dimension_numbers = #tpu.dot_dimension_numbers<[1], [0], [0], [1], [0, 0, 1, 1], [], []>} : vector<32x8xf32>, vector<8x16xf32>, vector<32x16xf32> -> vector<32x16xf32>
    %c0_85 = arith.constant 0 : index
    %c0_86 = arith.constant 0 : index
    %130 = vector.load %arg17[%c0_85, %c0_86] : memref<1x16xf32, #tpu.memory_space<vmem>>, vector<1x16xf32>
    %131 = vector.broadcast %130 : vector<1x16xf32> to vector<32x16xf32>
    %132 = arith.addf %129, %131 : vector<32x16xf32>
    %133 = arith.addf %127, %132 : vector<32x16xf32>
    %cst_87 = arith.constant 0.000000e+00 : f32
    %134 = vector.broadcast %cst_87 : f32 to vector<32x16xf32>
    %135 = arith.maximumf %133, %134 : vector<32x16xf32>
    %c0_88 = arith.constant 0 : index
    %c0_89 = arith.constant 0 : index
    %136 = vector.load %arg18[%c0_88, %c0_89] : memref<16x8xf32, #tpu.memory_space<vmem>>, vector<16x8xf32>
    %cst_90 = arith.constant dense<0.000000e+00> : vector<32x8xf32>
    %137 = tpu.matmul %135, %136, %cst_90 {dimension_numbers = #tpu.dot_dimension_numbers<[1], [0], [0], [1], [0, 0, 1, 1], [], []>} : vector<32x16xf32>, vector<16x8xf32>, vector<32x8xf32> -> vector<32x8xf32>
    %c0_91 = arith.constant 0 : index
    %c0_92 = arith.constant 0 : index
    %138 = vector.load %arg19[%c0_91, %c0_92] : memref<1x8xf32, #tpu.memory_space<vmem>>, vector<1x8xf32>
    %139 = vector.broadcast %138 : vector<1x8xf32> to vector<32x8xf32>
    %140 = arith.addf %137, %139 : vector<32x8xf32>
    %141 = vector.extract_strided_slice %140 {offsets = [0, 0], sizes = [32, 4], strides = [1, 1]} : vector<32x8xf32> to vector<32x4xf32>
    %142 = vector.extract_strided_slice %140 {offsets = [0, 4], sizes = [32, 4], strides = [1, 1]} : vector<32x8xf32> to vector<32x4xf32>
    %c0_93 = arith.constant 0 : index
    %c0_94 = arith.constant 0 : index
    %143 = vector.load %arg1[%c0_93, %c0_94] : memref<32x4xf32, #tpu.memory_space<vmem>>, vector<32x4xf32>
    %cst_95 = arith.constant 5.000000e-01 : f32
    %144 = vector.broadcast %cst_95 : f32 to vector<32x4xf32>
    %145 = arith.mulf %142, %144 : vector<32x4xf32>
    %146 = math.exp %145 : vector<32x4xf32>
    %147 = arith.mulf %143, %146 : vector<32x4xf32>
    %148 = arith.addf %141, %147 : vector<32x4xf32>
    %c0_96 = arith.constant 0 : index
    %c0_97 = arith.constant 0 : index
    %149 = vector.load %arg20[%c0_96, %c0_97] : memref<4x16xf32, #tpu.memory_space<vmem>>, vector<4x16xf32>
    %cst_98 = arith.constant dense<0.000000e+00> : vector<32x16xf32>
    %150 = tpu.matmul %148, %149, %cst_98 {dimension_numbers = #tpu.dot_dimension_numbers<[1], [0], [0], [1], [0, 0, 1, 1], [], []>} : vector<32x4xf32>, vector<4x16xf32>, vector<32x16xf32> -> vector<32x16xf32>
    %c0_99 = arith.constant 0 : index
    %c0_100 = arith.constant 0 : index
    %151 = vector.load %arg21[%c0_99, %c0_100] : memref<1x16xf32, #tpu.memory_space<vmem>>, vector<1x16xf32>
    %152 = vector.broadcast %151 : vector<1x16xf32> to vector<32x16xf32>
    %153 = arith.addf %150, %152 : vector<32x16xf32>
    %c1_i32_101 = arith.constant 1 : i32
    %154 = vector.broadcast %c1_i32_101 : i32 to vector<32x1xi32>
    %155 = arith.cmpi sge, %16, %154 : vector<32x1xi32>
    %156 = arith.extui %155 : vector<32x1xi1> to vector<32x1xi32>
    %157 = arith.sitofp %156 : vector<32x1xi32> to vector<32x1xf32>
    %c1_i32_102 = arith.constant 1 : i32
    %158 = tpu.dynamic_rotate %153 by %c1_i32_102 dim 0 : vector<32x16xf32>, i32 -> vector<32x16xf32>
    %159 = vector.broadcast %157 : vector<32x1xf32> to vector<32x16xf32>
    %160 = arith.mulf %158, %159 : vector<32x16xf32>
    %c0_103 = arith.constant 0 : index
    %c0_104 = arith.constant 0 : index
    %c0_105 = arith.constant 0 : index
    %161 = vector.load %arg22[%c0_103, %c0_104, %c0_105] : memref<2x16x16xf32, #tpu.memory_space<vmem>>, vector<1x16x16xf32>
    %162 = vector.shape_cast %161 : vector<1x16x16xf32> to vector<16x16xf32>
    %cst_106 = arith.constant dense<0.000000e+00> : vector<32x16xf32>
    %163 = tpu.matmul %160, %162, %cst_106 {dimension_numbers = #tpu.dot_dimension_numbers<[1], [0], [0], [1], [0, 0, 1, 1], [], []>} : vector<32x16xf32>, vector<16x16xf32>, vector<32x16xf32> -> vector<32x16xf32>
    %c1_107 = arith.constant 1 : index
    %c0_108 = arith.constant 0 : index
    %c0_109 = arith.constant 0 : index
    %164 = vector.load %arg22[%c1_107, %c0_108, %c0_109] : memref<2x16x16xf32, #tpu.memory_space<vmem>>, vector<1x16x16xf32>
    %165 = vector.shape_cast %164 : vector<1x16x16xf32> to vector<16x16xf32>
    %cst_110 = arith.constant dense<0.000000e+00> : vector<32x16xf32>
    %166 = tpu.matmul %153, %165, %cst_110 {dimension_numbers = #tpu.dot_dimension_numbers<[1], [0], [0], [1], [0, 0, 1, 1], [], []>} : vector<32x16xf32>, vector<16x16xf32>, vector<32x16xf32> -> vector<32x16xf32>
    %167 = arith.addf %163, %166 : vector<32x16xf32>
    %c0_111 = arith.constant 0 : index
    %c0_112 = arith.constant 0 : index
    %168 = vector.load %arg23[%c0_111, %c0_112] : memref<1x16xf32, #tpu.memory_space<vmem>>, vector<1x16xf32>
    %169 = vector.broadcast %168 : vector<1x16xf32> to vector<32x16xf32>
    %170 = arith.addf %167, %169 : vector<32x16xf32>
    %cst_113 = arith.constant 0.000000e+00 : f32
    %171 = vector.broadcast %cst_113 : f32 to vector<32x16xf32>
    %172 = arith.maximumf %170, %171 : vector<32x16xf32>
    %c1_i32_114 = arith.constant 1 : i32
    %173 = tpu.dynamic_rotate %172 by %c1_i32_114 dim 0 : vector<32x16xf32>, i32 -> vector<32x16xf32>
    %174 = vector.broadcast %157 : vector<32x1xf32> to vector<32x16xf32>
    %175 = arith.mulf %173, %174 : vector<32x16xf32>
    %c0_115 = arith.constant 0 : index
    %c0_116 = arith.constant 0 : index
    %c0_117 = arith.constant 0 : index
    %176 = vector.load %arg24[%c0_115, %c0_116, %c0_117] : memref<2x16x16xf32, #tpu.memory_space<vmem>>, vector<1x16x16xf32>
    %177 = vector.shape_cast %176 : vector<1x16x16xf32> to vector<16x16xf32>
    %cst_118 = arith.constant dense<0.000000e+00> : vector<32x16xf32>
    %178 = tpu.matmul %175, %177, %cst_118 {dimension_numbers = #tpu.dot_dimension_numbers<[1], [0], [0], [1], [0, 0, 1, 1], [], []>} : vector<32x16xf32>, vector<16x16xf32>, vector<32x16xf32> -> vector<32x16xf32>
    %c1_119 = arith.constant 1 : index
    %c0_120 = arith.constant 0 : index
    %c0_121 = arith.constant 0 : index
    %179 = vector.load %arg24[%c1_119, %c0_120, %c0_121] : memref<2x16x16xf32, #tpu.memory_space<vmem>>, vector<1x16x16xf32>
    %180 = vector.shape_cast %179 : vector<1x16x16xf32> to vector<16x16xf32>
    %cst_122 = arith.constant dense<0.000000e+00> : vector<32x16xf32>
    %181 = tpu.matmul %172, %180, %cst_122 {dimension_numbers = #tpu.dot_dimension_numbers<[1], [0], [0], [1], [0, 0, 1, 1], [], []>} : vector<32x16xf32>, vector<16x16xf32>, vector<32x16xf32> -> vector<32x16xf32>
    %182 = arith.addf %178, %181 : vector<32x16xf32>
    %c0_123 = arith.constant 0 : index
    %c0_124 = arith.constant 0 : index
    %183 = vector.load %arg25[%c0_123, %c0_124] : memref<1x16xf32, #tpu.memory_space<vmem>>, vector<1x16xf32>
    %184 = vector.broadcast %183 : vector<1x16xf32> to vector<32x16xf32>
    %185 = arith.addf %182, %184 : vector<32x16xf32>
    %cst_125 = arith.constant 0.000000e+00 : f32
    %186 = vector.broadcast %cst_125 : f32 to vector<32x16xf32>
    %187 = arith.maximumf %185, %186 : vector<32x16xf32>
    %188 = arith.addf %187, %153 : vector<32x16xf32>
    %cst_126 = arith.constant 0.000000e+00 : f32
    %189 = vector.broadcast %cst_126 : f32 to vector<32x16xf32>
    %190 = arith.maximumf %188, %189 : vector<32x16xf32>
    %c2_i32_127 = arith.constant 2 : i32
    %191 = vector.broadcast %c2_i32_127 : i32 to vector<32x1xi32>
    %192 = arith.cmpi sge, %16, %191 : vector<32x1xi32>
    %193 = arith.extui %192 : vector<32x1xi1> to vector<32x1xi32>
    %194 = arith.sitofp %193 : vector<32x1xi32> to vector<32x1xf32>
    %c2_i32_128 = arith.constant 2 : i32
    %195 = tpu.dynamic_rotate %190 by %c2_i32_128 dim 0 : vector<32x16xf32>, i32 -> vector<32x16xf32>
    %196 = vector.broadcast %194 : vector<32x1xf32> to vector<32x16xf32>
    %197 = arith.mulf %195, %196 : vector<32x16xf32>
    %c0_129 = arith.constant 0 : index
    %c0_130 = arith.constant 0 : index
    %c0_131 = arith.constant 0 : index
    %198 = vector.load %arg26[%c0_129, %c0_130, %c0_131] : memref<2x16x8xf32, #tpu.memory_space<vmem>>, vector<1x16x8xf32>
    %199 = vector.shape_cast %198 : vector<1x16x8xf32> to vector<16x8xf32>
    %cst_132 = arith.constant dense<0.000000e+00> : vector<32x8xf32>
    %200 = tpu.matmul %197, %199, %cst_132 {dimension_numbers = #tpu.dot_dimension_numbers<[1], [0], [0], [1], [0, 0, 1, 1], [], []>} : vector<32x16xf32>, vector<16x8xf32>, vector<32x8xf32> -> vector<32x8xf32>
    %c1_133 = arith.constant 1 : index
    %c0_134 = arith.constant 0 : index
    %c0_135 = arith.constant 0 : index
    %201 = vector.load %arg26[%c1_133, %c0_134, %c0_135] : memref<2x16x8xf32, #tpu.memory_space<vmem>>, vector<1x16x8xf32>
    %202 = vector.shape_cast %201 : vector<1x16x8xf32> to vector<16x8xf32>
    %cst_136 = arith.constant dense<0.000000e+00> : vector<32x8xf32>
    %203 = tpu.matmul %190, %202, %cst_136 {dimension_numbers = #tpu.dot_dimension_numbers<[1], [0], [0], [1], [0, 0, 1, 1], [], []>} : vector<32x16xf32>, vector<16x8xf32>, vector<32x8xf32> -> vector<32x8xf32>
    %204 = arith.addf %200, %203 : vector<32x8xf32>
    %c0_137 = arith.constant 0 : index
    %c0_138 = arith.constant 0 : index
    %205 = vector.load %arg27[%c0_137, %c0_138] : memref<1x8xf32, #tpu.memory_space<vmem>>, vector<1x8xf32>
    %206 = vector.broadcast %205 : vector<1x8xf32> to vector<32x8xf32>
    %207 = arith.addf %204, %206 : vector<32x8xf32>
    %cst_139 = arith.constant 0.000000e+00 : f32
    %208 = vector.broadcast %cst_139 : f32 to vector<32x8xf32>
    %209 = arith.maximumf %207, %208 : vector<32x8xf32>
    %c2_i32_140 = arith.constant 2 : i32
    %210 = tpu.dynamic_rotate %209 by %c2_i32_140 dim 0 : vector<32x8xf32>, i32 -> vector<32x8xf32>
    %211 = vector.broadcast %194 : vector<32x1xf32> to vector<32x8xf32>
    %212 = arith.mulf %210, %211 : vector<32x8xf32>
    %c0_141 = arith.constant 0 : index
    %c0_142 = arith.constant 0 : index
    %c0_143 = arith.constant 0 : index
    %213 = vector.load %arg28[%c0_141, %c0_142, %c0_143] : memref<2x8x8xf32, #tpu.memory_space<vmem>>, vector<1x8x8xf32>
    %214 = vector.shape_cast %213 : vector<1x8x8xf32> to vector<8x8xf32>
    %cst_144 = arith.constant dense<0.000000e+00> : vector<32x8xf32>
    %215 = tpu.matmul %212, %214, %cst_144 {dimension_numbers = #tpu.dot_dimension_numbers<[1], [0], [0], [1], [0, 0, 1, 1], [], []>} : vector<32x8xf32>, vector<8x8xf32>, vector<32x8xf32> -> vector<32x8xf32>
    %c1_145 = arith.constant 1 : index
    %c0_146 = arith.constant 0 : index
    %c0_147 = arith.constant 0 : index
    %216 = vector.load %arg28[%c1_145, %c0_146, %c0_147] : memref<2x8x8xf32, #tpu.memory_space<vmem>>, vector<1x8x8xf32>
    %217 = vector.shape_cast %216 : vector<1x8x8xf32> to vector<8x8xf32>
    %cst_148 = arith.constant dense<0.000000e+00> : vector<32x8xf32>
    %218 = tpu.matmul %209, %217, %cst_148 {dimension_numbers = #tpu.dot_dimension_numbers<[1], [0], [0], [1], [0, 0, 1, 1], [], []>} : vector<32x8xf32>, vector<8x8xf32>, vector<32x8xf32> -> vector<32x8xf32>
    %219 = arith.addf %215, %218 : vector<32x8xf32>
    %c0_149 = arith.constant 0 : index
    %c0_150 = arith.constant 0 : index
    %220 = vector.load %arg29[%c0_149, %c0_150] : memref<1x8xf32, #tpu.memory_space<vmem>>, vector<1x8xf32>
    %221 = vector.broadcast %220 : vector<1x8xf32> to vector<32x8xf32>
    %222 = arith.addf %219, %221 : vector<32x8xf32>
    %cst_151 = arith.constant 0.000000e+00 : f32
    %223 = vector.broadcast %cst_151 : f32 to vector<32x8xf32>
    %224 = arith.maximumf %222, %223 : vector<32x8xf32>
    %c0_152 = arith.constant 0 : index
    %c0_153 = arith.constant 0 : index
    %225 = vector.load %arg30[%c0_152, %c0_153] : memref<16x8xf32, #tpu.memory_space<vmem>>, vector<16x8xf32>
    %cst_154 = arith.constant dense<0.000000e+00> : vector<32x8xf32>
    %226 = tpu.matmul %190, %225, %cst_154 {dimension_numbers = #tpu.dot_dimension_numbers<[1], [0], [0], [1], [0, 0, 1, 1], [], []>} : vector<32x16xf32>, vector<16x8xf32>, vector<32x8xf32> -> vector<32x8xf32>
    %c0_155 = arith.constant 0 : index
    %c0_156 = arith.constant 0 : index
    %227 = vector.load %arg31[%c0_155, %c0_156] : memref<1x8xf32, #tpu.memory_space<vmem>>, vector<1x8xf32>
    %228 = vector.broadcast %227 : vector<1x8xf32> to vector<32x8xf32>
    %229 = arith.addf %226, %228 : vector<32x8xf32>
    %230 = arith.addf %224, %229 : vector<32x8xf32>
    %cst_157 = arith.constant 0.000000e+00 : f32
    %231 = vector.broadcast %cst_157 : f32 to vector<32x8xf32>
    %232 = arith.maximumf %230, %231 : vector<32x8xf32>
    %c4_i32_158 = arith.constant 4 : i32
    %233 = vector.broadcast %c4_i32_158 : i32 to vector<32x1xi32>
    %234 = arith.cmpi sge, %16, %233 : vector<32x1xi32>
    %235 = arith.extui %234 : vector<32x1xi1> to vector<32x1xi32>
    %236 = arith.sitofp %235 : vector<32x1xi32> to vector<32x1xf32>
    %c4_i32_159 = arith.constant 4 : i32
    %237 = tpu.dynamic_rotate %232 by %c4_i32_159 dim 0 : vector<32x8xf32>, i32 -> vector<32x8xf32>
    %238 = vector.broadcast %236 : vector<32x1xf32> to vector<32x8xf32>
    %239 = arith.mulf %237, %238 : vector<32x8xf32>
    %c0_160 = arith.constant 0 : index
    %c0_161 = arith.constant 0 : index
    %c0_162 = arith.constant 0 : index
    %240 = vector.load %arg32[%c0_160, %c0_161, %c0_162] : memref<2x8x1xf32, #tpu.memory_space<vmem>>, vector<1x8x1xf32>
    %241 = vector.shape_cast %240 : vector<1x8x1xf32> to vector<8x1xf32>
    %cst_163 = arith.constant dense<0.000000e+00> : vector<32x1xf32>
    %242 = tpu.matmul %239, %241, %cst_163 {dimension_numbers = #tpu.dot_dimension_numbers<[1], [0], [0], [1], [0, 0, 1, 1], [], []>} : vector<32x8xf32>, vector<8x1xf32>, vector<32x1xf32> -> vector<32x1xf32>
    %c1_164 = arith.constant 1 : index
    %c0_165 = arith.constant 0 : index
    %c0_166 = arith.constant 0 : index
    %243 = vector.load %arg32[%c1_164, %c0_165, %c0_166] : memref<2x8x1xf32, #tpu.memory_space<vmem>>, vector<1x8x1xf32>
    %244 = vector.shape_cast %243 : vector<1x8x1xf32> to vector<8x1xf32>
    %cst_167 = arith.constant dense<0.000000e+00> : vector<32x1xf32>
    %245 = tpu.matmul %232, %244, %cst_167 {dimension_numbers = #tpu.dot_dimension_numbers<[1], [0], [0], [1], [0, 0, 1, 1], [], []>} : vector<32x8xf32>, vector<8x1xf32>, vector<32x1xf32> -> vector<32x1xf32>
    %246 = arith.addf %242, %245 : vector<32x1xf32>
    %c0_168 = arith.constant 0 : index
    %c0_169 = arith.constant 0 : index
    %247 = vector.load %arg33[%c0_168, %c0_169] : memref<1x1xf32, #tpu.memory_space<vmem>>, vector<1x1xf32>
    %248 = vector.broadcast %247 : vector<1x1xf32> to vector<32x1xf32>
    %249 = arith.addf %246, %248 : vector<32x1xf32>
    %cst_170 = arith.constant 0.000000e+00 : f32
    %250 = vector.broadcast %cst_170 : f32 to vector<32x1xf32>
    %251 = arith.maximumf %249, %250 : vector<32x1xf32>
    %c4_i32_171 = arith.constant 4 : i32
    %252 = tpu.dynamic_rotate %251 by %c4_i32_171 dim 0 : vector<32x1xf32>, i32 -> vector<32x1xf32>
    %253 = arith.mulf %252, %236 : vector<32x1xf32>
    %c0_172 = arith.constant 0 : index
    %c0_173 = arith.constant 0 : index
    %c0_174 = arith.constant 0 : index
    %254 = vector.load %arg34[%c0_172, %c0_173, %c0_174] : memref<2x1x1xf32, #tpu.memory_space<vmem>>, vector<1x1x1xf32>
    %255 = vector.shape_cast %254 : vector<1x1x1xf32> to vector<1x1xf32>
    %cst_175 = arith.constant dense<0.000000e+00> : vector<32x1xf32>
    %256 = tpu.matmul %253, %255, %cst_175 {dimension_numbers = #tpu.dot_dimension_numbers<[1], [0], [0], [1], [0, 0, 1, 1], [], []>} : vector<32x1xf32>, vector<1x1xf32>, vector<32x1xf32> -> vector<32x1xf32>
    %c1_176 = arith.constant 1 : index
    %c0_177 = arith.constant 0 : index
    %c0_178 = arith.constant 0 : index
    %257 = vector.load %arg34[%c1_176, %c0_177, %c0_178] : memref<2x1x1xf32, #tpu.memory_space<vmem>>, vector<1x1x1xf32>
    %258 = vector.shape_cast %257 : vector<1x1x1xf32> to vector<1x1xf32>
    %cst_179 = arith.constant dense<0.000000e+00> : vector<32x1xf32>
    %259 = tpu.matmul %251, %258, %cst_179 {dimension_numbers = #tpu.dot_dimension_numbers<[1], [0], [0], [1], [0, 0, 1, 1], [], []>} : vector<32x1xf32>, vector<1x1xf32>, vector<32x1xf32> -> vector<32x1xf32>
    %260 = arith.addf %256, %259 : vector<32x1xf32>
    %c0_180 = arith.constant 0 : index
    %c0_181 = arith.constant 0 : index
    %261 = vector.load %arg35[%c0_180, %c0_181] : memref<1x1xf32, #tpu.memory_space<vmem>>, vector<1x1xf32>
    %262 = vector.broadcast %261 : vector<1x1xf32> to vector<32x1xf32>
    %263 = arith.addf %260, %262 : vector<32x1xf32>
    %cst_182 = arith.constant 0.000000e+00 : f32
    %264 = vector.broadcast %cst_182 : f32 to vector<32x1xf32>
    %265 = arith.maximumf %263, %264 : vector<32x1xf32>
    %c0_183 = arith.constant 0 : index
    %c0_184 = arith.constant 0 : index
    %266 = vector.load %arg36[%c0_183, %c0_184] : memref<8x1xf32, #tpu.memory_space<vmem>>, vector<8x1xf32>
    %cst_185 = arith.constant dense<0.000000e+00> : vector<32x1xf32>
    %267 = tpu.matmul %232, %266, %cst_185 {dimension_numbers = #tpu.dot_dimension_numbers<[1], [0], [0], [1], [0, 0, 1, 1], [], []>} : vector<32x8xf32>, vector<8x1xf32>, vector<32x1xf32> -> vector<32x1xf32>
    %c0_186 = arith.constant 0 : index
    %c0_187 = arith.constant 0 : index
    %268 = vector.load %arg37[%c0_186, %c0_187] : memref<1x1xf32, #tpu.memory_space<vmem>>, vector<1x1xf32>
    %269 = vector.broadcast %268 : vector<1x1xf32> to vector<32x1xf32>
    %270 = arith.addf %267, %269 : vector<32x1xf32>
    %271 = arith.addf %265, %270 : vector<32x1xf32>
    %cst_188 = arith.constant 0.000000e+00 : f32
    %272 = vector.broadcast %cst_188 : f32 to vector<32x1xf32>
    %273 = arith.maximumf %271, %272 : vector<32x1xf32>
    %274 = arith.negf %273 : vector<32x1xf32>
    %275 = math.exp %274 : vector<32x1xf32>
    %cst_189 = arith.constant 1.000000e+00 : f32
    %276 = vector.broadcast %cst_189 : f32 to vector<32x1xf32>
    %277 = arith.addf %276, %275 : vector<32x1xf32>
    %278 = arith.divf %276, %277 : vector<32x1xf32>
    %c0_190 = arith.constant 0 : index
    %c0_191 = arith.constant 0 : index
    %279 = vector.load %arg38[%c0_190, %c0_191] : memref<32x1xf32, #tpu.memory_space<vmem>>, vector<32x1xf32>
    tpu.vector_store %arg38[%c0_190, %c0_191], %278 {strides = array<i32>} : memref<32x1xf32, #tpu.memory_space<vmem>>, vector<32x1xf32>,
    %c0_192 = arith.constant 0 : index
    %c0_193 = arith.constant 0 : index
    %280 = vector.load %arg39[%c0_192, %c0_193] : memref<32x4xf32, #tpu.memory_space<vmem>>, vector<32x4xf32>
    tpu.vector_store %arg39[%c0_192, %c0_193], %141 {strides = array<i32>} : memref<32x4xf32, #tpu.memory_space<vmem>>, vector<32x4xf32>,
    %c0_194 = arith.constant 0 : index
    %c0_195 = arith.constant 0 : index
    %281 = vector.load %arg40[%c0_194, %c0_195] : memref<32x4xf32, #tpu.memory_space<vmem>>, vector<32x4xf32>
    tpu.vector_store %arg40[%c0_194, %c0_195], %142 {strides = array<i32>} : memref<32x4xf32, #tpu.memory_space<vmem>>, vector<32x4xf32>,
    return
  }
}

</mosaic_0001>

<bundles_post_ra>
// kernel: tpu_custom_call.1
= control target key start
LH: loop header
LB: loop body
LE: loop exit
PB: predicated region body
PF: predicated region fallthrough
CT: control target
= control target key end

     0   :  { %v173_v0 = vlaneseq  ;;  %s4525_s3 = smov 2   ;;  %s4526_s10 = smov 3   ;;  %vm271_vm0 = vcmask 1040384   ;;  %vm258_vm1 = vcmask 7168   ;;  %v4527_v16 = vmov 0.0   ;;  %s5084_s0 = inlined_call_operand.smem [shape: u32[41], index: -1, kind: input, shape index: {}] }
   0x1   :  { %s3738_s6 = sld [smem:[%s5084_s0 + %s4525_s3]]   ;;  %s4528_s14 = smov 4   ;;  %vm971_vm8 = vcmask 64512   ;;  %vm1539_vm12 = vcmask 130048   ;;  %vm2004_vm13 = vcmask 31744   ;;  %vm2017_vm14 = vcmask 1043456  }
   0x2   :  { %s1_s9 = sld [smem:[%s5084_s0]]   ;;  %v4578_v1 = vshrl.u32 %v173_v0, 7  ;;  %s4529_s18 = smov 5  }
   0x3   :  { %s3739_s13 = sld [smem:[%s5084_s0 + %s4526_s10]]   ;;  %s4530_s22 = smov 6  }
   0x4   :  { %v4584_v2 = vand.u32 15, %v4578_v1  ;;  %v176_v3 = vadd.s32 16, %v4578_v1  ;;  %vm246_vm3 = vcmp.lt.s32.totalorder %v4578_v1, 1  ;;  %s3740_s17 = sld [smem:[%s5084_s0 + %s4528_s14]]   ;;  %s4531_s26 = smov 8   ;;  %vm729_vm5 = vcmp.lt.s32.totalorder %v4578_v1, 2 }
   0x5   :  { %s3741_s21 = sld [smem:[%s5084_s0 + %s4529_s18]]   ;;  %s4532_s30 = smov 10   ;;  %vm1301_vm9 = vcmp.lt.s32.totalorder %v4578_v1, 4 }
   0x6   :  { %vm230_vm2 = vcmp.ge.s32.totalorder %v4584_v2, 1  ;;  %v4593_v7 = vand.u32 15, %v176_v3  ;;  %s3742_s25 = sld [smem:[%s5084_s0 + %s4530_s22]]   ;;  %vm713_vm6 = vcmp.ge.s32.totalorder %v4584_v2, 2  ;;  %s4533_s4 = smov 7   ;;  %vm1285_vm10 = vcmp.ge.s32.totalorder %v4584_v2, 4 }
   0x7   :  { %v3779_v4 = vld [vmem:[%s3738_s6 + $0x1] sm:$0x1]  ;;  %v255_v10 = vld [vmem:[%s3738_s6] sm:$0x1]  ;;  %v4610_v17 = vsel %vm230_vm2, 1.0, %v4527_v16  ;;  %s4675_s29 = sld [smem:[%s5084_s0 + %s4531_s26]]   ;;  %s4534_s8 = smov 12  }
   0x8   :  { %v4588_v5 = vld [vmem:[%s1_s9] sm:$0xff]  ;;  %v4590_v6 = vld [vmem:[%s1_s9 + $0x8] sm:$0xff]  ;;  %4111 = vmatprep.subr.msk.mxu0 %vm271_vm0, %v3779_v4  ;;  %v4600_v11 = vld [vmem:[%s1_s9 + $0x10] sm:$0xff]  ;;  %vm232_vm4 = vcmp.ge.s32.totalorder %v4593_v7, 1  ;;  %s3746_s3 = sld [smem:[%s5084_s0 + %s4532_s30]]   ;;  %vm715_vm7 = vcmp.ge.s32.totalorder %v4593_v7, 2  ;;  %s4535_s12 = smov 14  }
   0x9   :  { %v242_v8 = vrot.slane %v4588_v5, 7  ;;  %4113 = vmatprep.mubr.msk.f32.mxu0 %vm258_vm1, %v4588_v5  ;;  %v243_v9 = vrot.slane %v4590_v6, 7  ;;  %v4602_v12 = vld [vmem:[%s1_s9 + $0x18] sm:$0xff]  ;;  %v87_v13 = vstv %s3739_s13  ;;  %4112 = vmatpush3.msk.msra.mxu0 %vm271_vm0, %v3779_v4  ;;  %v244_v14 = vrot.slane %v4600_v11, 7  ;;  %s3743_s7 = sld [smem:[%s5084_s0 + %s4533_s4]]   ;;  %s4536_s16 = smov 9  }
   0xa   :  { %v245_v15 = vrot.slane %v4602_v12, 7  ;;  %88 = vst [vmem:[#allocation2] sm:$0x1] %v87_v13  ;;  %4114 = vmatmul.mubr.msk.f32.vlgmr.msra.gmra.mrb[0].mxu0 %vm258_vm1, %v4590_v6  ;;  %4119 = vmatprep.subr.msk.mxu0 %vm271_vm0, %v255_v10  ;;  %v4623_v20 = vsel %vm232_vm4, 1.0, %v4527_v16  ;;  %v3791_v25 = vld [vmem:[%s3740_s17 + $0x1] sm:$0x1]  ;;  %s3748_s11 = sld [smem:[%s5084_s0 + %s4534_s8]]  }
   0xb   :  { %4120 = vmatpush3.msk.msra.mxu0 %vm271_vm0, %v255_v10  ;;  %4116 = vmatprep.mubr.msk.f32.mxu0 %vm258_vm1, %v4600_v11  ;;  %v248_v21 = vsel %vm246_vm3, %v243_v9, %v244_v14  ;;  %v249_v22 = vsel %vm246_vm3, %v242_v8, %v243_v9  ;;  %v487_v26 = vld [vmem:[%s3740_s17] sm:$0x1]  ;;  %v89_v27 = vstv %s3741_s21  ;;  %s4747_s15 = sld [smem:[%s5084_s0 + %s4535_s12]]   ;;  %s4537_s20 = smov 11   ;;  %vm1287_vm11 = vcmp.ge.s32.totalorder %v4593_v7, 4 }
   0xc   :  { %v250_v18 = vsel %vm246_vm3, %v245_v15, %v242_v8  ;;  %v253_v23 = vmul.f32 %v4623_v20, %v248_v21  ;;  %v247_v24 = vsel %vm246_vm3, %v244_v14, %v245_v15  ;;  %4127 = vmatprep.subr.msk.mxu1 %vm271_vm0, %v3791_v25  ;;  %90 = vst [vmem:[#allocation3] sm:$0x1] %v89_v27  ;;  %v3805_v51 = vld [vmem:[%s3742_s25 + $0x1] sm:$0x1]  ;;  %v738_v52 = vld [vmem:[%s3742_s25] sm:$0x1]  ;;  %s3745_s19 = sld [smem:[%s5084_s0 + %s4536_s16]]  }
   0xd   :  { %v251_v19 = vmul.f32 %v4610_v17, %v250_v18  ;;  %4128 = vmatpush3.msk.msra.mxu1 %vm271_vm0, %v3791_v25  ;;  %4143 = vmatprep.subr.msk.mxu0 %vm271_vm0, %v3805_v51  ;;  %v3817_v53 = vld [vmem:[%s4675_s29 + $0x8] sm:$0xff]  ;;  %s3747_s23 = sld [smem:[%s5084_s0 + %s4537_s20]]   ;;  %s4538_s24 = smov 16   ;;  %v4772_v2 = vsel %vm1287_vm11, 1.0, %v4527_v16 }
   0xe   :  { %4117 = vmatmul.mubr.msk.f32.gmra.mrb[2].mxu0 %vm258_vm1, %v4602_v12  ;;  %4135 = vmatprep.subr.msk.mxu1 %vm271_vm0, %v487_v26  ;;  %s3752_s27 = sld [smem:[%s5084_s0 + %s4538_s24]]   ;;  %s4539_s28 = smov 13  }
   0xf   :  { %4121 = vmatprep.mubr.msk.f32.mxu0 %vm258_vm1, %v251_v19  ;;  %s3749_s1 = sld [smem:[%s5084_s0 + %s4539_s28]]   ;;  %s4540_s2 = smov 18  }
  0x10   :  { %s3754_s5 = sld [smem:[%s5084_s0 + %s4540_s2]]   ;;  %s4541_s6 = smov 15  }
  0x11   :  { %v3790_v28 = vld [vmem:[#allocation2] ss:$0 sm:$0xff]  ;;  %s3751_s9 = sld [smem:[%s5084_s0 + %s4541_s6]]   ;;  %s4542_s10 = smov 17  }
  0x12   :  { %4122 = vmatmul.mubr.msk.f32.vlgmr.msra.gmra.mrb[0].mxu0 %vm258_vm1, %v249_v22  ;;  %s3753_s13 = sld [smem:[%s5084_s0 + %s4542_s10]]   ;;  %s4543_s14 = smov 19  }
  0x13   :  { %4124 = vmatprep.mubr.msk.f32.mxu0 %vm258_vm1, %v253_v23  ;;  %4144 = vmatpush3.msk.msra.mxu0 %vm271_vm0, %v3805_v51  ;;  %v3802_v54 = vld [vmem:[#allocation3] ss:$0 sm:$0xff]  ;;  %v4694_v23 = vsel %vm713_vm6, 1.0, %v4527_v16  ;;  %s3755_s17 = sld [smem:[%s5084_s0 + %s4543_s14]]   ;;  %s4544_s18 = smov 39  }
  0x14   :  { %4151 = vmatprep.subr.msk.mxu0 %vm271_vm0, %v738_v52  ;;  %s3775_s21 = sld [smem:[%s5084_s0 + %s4544_s18]]   ;;  %s4545_s22 = smov 20  }
  0x15   :  { %s3756_s25 = sld [smem:[%s5084_s0 + %s4545_s22]]   ;;  %s4546_s26 = smov 124  }
  0x16   :  { %4125 = vmatmul.mubr.msk.f32.gmra.mrb[2].mxu0 %vm258_vm1, %v247_v24  ;;  %v4699_v24 = vsel %vm715_vm7, 1.0, %v4527_v16 }
  0xe5   :  { %v4123_v29 = vpop.f32.mrb[0].mxu0 }
  0xe6   :  { %v468_v30 = vadd.f32 %v4123_v29, %v3790_v28  ;;  %v441_v31 = vpop.f32.mrb[1].mxu0 }
  0xe7   :  { %v467_v32 = vadd.f32 %v3790_v28, %v441_v31  ;;  %v3816_v31 = vld [vmem:[%s3743_s7] ss:$0 sm:$0xff]  ;;  %s4557_s7 = smov 27  }
  0xe8   :  { %v472_v33 = vmax.f32 %v468_v30, 0.0  ;;  %v968_v30 = vld [vmem:[%s4675_s29] sm:$0xff]  ;;  %s4555_s29 = smov 25   ;;  %s3763_s10 = sld [smem:[%s5084_s0 + %s4557_s7]]  }
  0xe9   :  { %v471_v34 = vmax.f32 %v467_v32, 0.0  ;;  %v4126_v35 = vpop.f32.mrb[2].mxu0  ;;  %s3761_s2 = sld [smem:[%s5084_s0 + %s4555_s29]]  }
  0xea   :  { %v476_v36 = vrot.slane %v472_v33, 7  ;;  %v470_v37 = vadd.f32 %v4126_v35, %v3790_v28  ;;  %v451_v38 = vpop.f32.mrb[3].mxu0 }
  0xeb   :  { %v475_v39 = vrot.slane %v471_v34, 7  ;;  %v469_v40 = vadd.f32 %v3790_v28, %v451_v38  ;;  %4129 = vmatprep.mubr.msk.f32.mxu1 %vm258_vm1, %v471_v34 }
  0xec   :  { %v474_v41 = vmax.f32 %v470_v37, 0.0  ;;  %4130 = vmatmul.mubr.msk.f32.vlgmr.msra.gmra.mrb[0].mxu1 %vm258_vm1, %v472_v33 }
  0xed   :  { %v481_v42 = vsel %vm246_vm3, %v475_v39, %v476_v36  ;;  %v473_v43 = vmax.f32 %v469_v40, 0.0  ;;  %4136 = vmatpush3.msk.msra.mxu1 %vm271_vm0, %v487_v26 }
  0xee   :  { %v478_v44 = vrot.slane %v474_v41, 7  ;;  %4159 = vmatprep.subr.mxu1 %v3817_v53 }
  0xef   :  { %v477_v45 = vrot.slane %v473_v43, 7  ;;  %4132 = vmatprep.mubr.msk.f32.mxu1 %vm258_vm1, %v473_v43 }
  0xf0   :  { %v482_v46 = vsel %vm246_vm3, %v478_v44, %v475_v39  ;;  %4133 = vmatmul.mubr.msk.f32.gmra.mrb[2].mxu1 %vm258_vm1, %v474_v41 }
  0xf1   :  { %v480_v47 = vsel %vm246_vm3, %v476_v36, %v477_v45  ;;  %v483_v48 = vmul.f32 %v4610_v17, %v482_v46  ;;  %v479_v49 = vsel %vm246_vm3, %v477_v45, %v478_v44 }
  0xf2   :  { %v485_v50 = vmul.f32 %v4623_v20, %v480_v47 }
  0xf3   :  { %4137 = vmatprep.mubr.msk.f32.mxu1 %vm258_vm1, %v483_v48 }
  0xf4   :  { %4138 = vmatmul.mubr.msk.f32.vlgmr.msra.gmra.mrb[0].mxu1 %vm258_vm1, %v481_v42 }
  0xf5   :  { %4140 = vmatprep.mubr.msk.f32.mxu1 %vm258_vm1, %v485_v50  ;;  %4160 = vmatpush3.msra.mxu1 %v3817_v53 }
  0xf6   :  { %4167 = vmatprep.subr.mxu1 %v968_v30 }
  0xf8   :  { %4141 = vmatmul.mubr.msk.f32.gmra.mrb[2].mxu1 %vm258_vm1, %v479_v49 }
 0x1c7   :  { %v4139_v55 = vpop.f32.mrb[0].mxu1 }
 0x1c8   :  { %v698_v56 = vadd.f32 %v4139_v55, %v3802_v54  ;;  %v671_v57 = vpop.f32.mrb[1].mxu1 }
 0x1c9   :  { %v697_v58 = vadd.f32 %v3802_v54, %v671_v57 }
 0x1ca   :  { %v702_v59 = vmax.f32 %v698_v56, 0.0 }
 0x1cb   :  { %v701_v60 = vmax.f32 %v697_v58, 0.0  ;;  %v4142_v61 = vpop.f32.mrb[2].mxu1  ;;  %v3835_v58 = vld [vmem:[%s3748_s11 + $0x8] sm:$0xff] }
 0x1cc   :  { %v706_v62 = vadd.f32 %v702_v59, %v4590_v6  ;;  %v700_v63 = vadd.f32 %v4142_v61, %v3802_v54  ;;  %v681_v0 = vpop.f32.mrb[3].mxu1  ;;  %v1181_v6 = vld [vmem:[%s3746_s3] sm:$0x1]  ;;  %v3846_v61 = vld [vmem:[%s4747_s15 + $0x18] sm:$0xff]  ;;  %s4556_s3 = smov 30  }
 0x1cd   :  { %v705_v3 = vadd.f32 %v701_v60, %v4588_v5  ;;  %v699_v4 = vadd.f32 %v3802_v54, %v681_v0  ;;  %v1310_v59 = vld [vmem:[%s3748_s11] sm:$0xff]  ;;  %v3845_v60 = vld [vmem:[%s4747_s15 + $0x10] sm:$0xff]  ;;  %s3766_s6 = sld [smem:[%s5084_s0 + %s4556_s3]]   ;;  %s4558_s11 = smov 32  }
 0x1ce   :  { %v710_v8 = vmax.f32 %v706_v62, 0.0  ;;  %v704_v9 = vmax.f32 %v700_v63, 0.0  ;;  %v4371_v62 = vpack.c.bf16 %v3846_v61, %v3845_v60  ;;  %v3826_v63 = vld [vmem:[%s3745_s19] ss:$0 sm:$0xff]  ;;  %s3768_s14 = sld [smem:[%s5084_s0 + %s4558_s11]]   ;;  %s4560_s19 = smov 33  }
 0x1cf   :  { %v709_v10 = vmax.f32 %v705_v3, 0.0  ;;  %v703_v13 = vmax.f32 %v699_v4, 0.0  ;;  %v3827_v0 = vld [vmem:[%s3747_s23] ss:$0 sm:$0xff]  ;;  %s3769_s22 = sld [smem:[%s5084_s0 + %s4560_s19]]   ;;  %s4561_s23 = smov 29  }
 0x1d0   :  { %v726_v14 = vrot.slane %v710_v8, 6  ;;  %v708_v15 = vadd.f32 %v704_v9, %v4602_v12 }
 0x1d1   :  { %v725_v18 = vrot.slane %v709_v10, 6  ;;  %v707_v19 = vadd.f32 %v703_v13, %v4600_v11  ;;  %4145 = vmatprep.mubr.msk.f32.mxu0 %vm258_vm1, %v709_v10 }
 0x1d2   :  { %v712_v21 = vmax.f32 %v708_v15, 0.0  ;;  %4146 = vmatmul.mubr.msk.f32.vlgmr.msra.gmra.mrb[4].mxu0 %vm258_vm1, %v710_v8 }
 0x1d3   :  { %v711_v5 = vmax.f32 %v707_v19, 0.0  ;;  %4152 = vmatpush3.msk.msra.mxu0 %vm271_vm0, %v738_v52  ;;  %v732_v22 = vsel %vm729_vm5, %v725_v18, %v726_v14 }
 0x1d4   :  { %v728_v12 = vrot.slane %v712_v21, 6  ;;  %4175 = vmatprep.subr.msk.mxu0 %vm271_vm0, %v1181_v6 }
 0x1d5   :  { %v727_v11 = vrot.slane %v711_v5, 6  ;;  %4148 = vmatprep.mubr.msk.f32.mxu0 %vm258_vm1, %v711_v5 }
 0x1d6   :  { %4149 = vmatmul.mubr.msk.f32.gmra.mrb[6].mxu0 %vm258_vm1, %v712_v21  ;;  %v733_v25 = vsel %vm729_vm5, %v728_v12, %v725_v18 }
 0x1d7   :  { %v734_v26 = vmul.f32 %v4694_v23, %v733_v25  ;;  %v731_v27 = vsel %vm729_vm5, %v726_v14, %v727_v11  ;;  %v730_v28 = vsel %vm729_vm5, %v727_v11, %v728_v12 }
 0x1d8   :  { %v736_v29 = vmul.f32 %v4699_v24, %v731_v27 }
 0x1d9   :  { %4153 = vmatprep.mubr.msk.f32.mxu0 %vm258_vm1, %v734_v26 }
 0x1da   :  { %4154 = vmatmul.mubr.msk.f32.vlgmr.msra.gmra.mrb[4].mxu0 %vm258_vm1, %v732_v22 }
 0x1db   :  { %4156 = vmatprep.mubr.msk.f32.mxu0 %vm258_vm1, %v736_v29  ;;  %4176 = vmatpush3.msk.msra.mxu0 %vm271_vm0, %v1181_v6 }
 0x1dc   :  { %4372 = vmatprep.subr.bf16.mxu0 %v4371_v62 }
 0x1de   :  { %4157 = vmatmul.mubr.msk.f32.gmra.mrb[6].mxu0 %vm258_vm1, %v730_v28 }
 0x1df   :  { %4177 = vmatprep.mubr.msk.f32.mxu0 %vm258_vm1, %v709_v10 }
 0x1e2   :  { %4178 = vmatmul.mubr.msk.f32.vlgmr.msra.gmra.mrb[8].mxu0 %vm258_vm1, %v710_v8 }
 0x1e3   :  { %4180 = vmatprep.mubr.msk.f32.mxu0 %vm258_vm1, %v711_v5  ;;  %4374 = vmatpush3.bf16.msra.mxu0 %v4371_v62 }
 0x1e6   :  { %4181 = vmatmul.mubr.msk.f32.gmra.mrb[10].mxu0 %vm258_vm1, %v712_v21 }
 0x2ad   :  { %v4155_v32 = vpop.f32.mrb[4].mxu0 }
 0x2ae   :  { %v949_v33 = vadd.f32 %v4155_v32, %v3816_v31  ;;  %v922_v34 = vpop.f32.mrb[5].mxu0 }
 0x2af   :  { %v948_v35 = vadd.f32 %v3816_v31, %v922_v34 }
 0x2b0   :  { %v953_v36 = vmax.f32 %v949_v33, 0.0  ;;  %v1749_v33 = vld [vmem:[%s3752_s27] sm:$0xff]  ;;  %s4547_s27 = smov 22  }
 0x2b1   :  { %v952_v37 = vmax.f32 %v948_v35, 0.0  ;;  %v4158_v38 = vpop.f32.mrb[6].mxu0  ;;  %s4851_s30 = sld [smem:[%s5084_s0 + %s4547_s27]]   ;;  %s4562_s27 = smov 31  }
 0x2b2   :  { %v957_v39 = vrot.slane %v953_v36, 6  ;;  %v951_v40 = vadd.f32 %v4158_v38, %v3816_v31  ;;  %v932_v41 = vpop.f32.mrb[7].mxu0  ;;  %v4768_v38 = vsel %vm1285_vm10, 1.0, %v4527_v16  ;;  %v1534_v16 = vld [vmem:[%s4747_s15] sm:$0xff] }
 0x2b3   :  { %v956_v42 = vrot.slane %v952_v37, 6  ;;  %v950_v43 = vadd.f32 %v3816_v31, %v932_v41  ;;  %4161 = vmatprep.mubr.msk.f32.mxu1 %vm971_vm8, %v952_v37 }
 0x2b4   :  { %v955_v44 = vmax.f32 %v951_v40, 0.0  ;;  %4162 = vmatmul.mubr.msk.f32.vlgmr.msra.gmra.mrb[4].mxu1 %vm971_vm8, %v953_v36 }
 0x2b5   :  { %v962_v45 = vsel %vm729_vm5, %v956_v42, %v957_v39  ;;  %v954_v46 = vmax.f32 %v950_v43, 0.0  ;;  %4168 = vmatpush3.msra.mxu1 %v968_v30  ;;  %v4179_v47 = vpop.f32.mrb[8].mxu0 }
 0x2b6   :  { %v959_v48 = vrot.slane %v955_v44, 6  ;;  %v1258_v49 = vpop.f32.mrb[9].mxu0  ;;  %4183 = vmatprep.subr.mxu1 %v3835_v58  ;;  %v1264_v10 = vadd.f32 %v4179_v47, %v3827_v0 }
 0x2b7   :  { %v958_v50 = vrot.slane %v954_v46, 6  ;;  %4164 = vmatprep.mubr.msk.f32.mxu1 %vm971_vm8, %v954_v46  ;;  %v1259_v14 = vadd.f32 %v3827_v0, %v1258_v49  ;;  %v3844_v46 = vld [vmem:[%s3749_s1] ss:$0 sm:$0xff]  ;;  %s4548_s1 = smov 1  }
 0x2b8   :  { %v963_v51 = vsel %vm729_vm5, %v959_v48, %v956_v42  ;;  %4165 = vmatmul.mubr.msk.f32.gmra.mrb[6].mxu1 %vm971_vm8, %v955_v44  ;;  %v1535_v44 = vld [vmem:[%s4747_s15 + $0x8] sm:$0xff]  ;;  %s3737_s4 = sld [smem:[%s5084_s0 + %s4548_s1]]   ;;  %s4559_s15 = smov 34  }
 0x2b9   :  { %v961_v52 = vsel %vm729_vm5, %v957_v39, %v958_v50  ;;  %v4182_v53 = vpop.f32.mrb[10].mxu0  ;;  %v964_v54 = vmul.f32 %v4694_v23, %v963_v51  ;;  %v960_v55 = vsel %vm729_vm5, %v958_v50, %v959_v48  ;;  %s5011_s18 = sld [smem:[%s5084_s0 + %s4559_s15]]   ;;  %s4563_s1 = smov 36  }
 0x2ba   :  { %v1268_v56 = vpop.f32.mrb[11].mxu0  ;;  %v966_v57 = vmul.f32 %v4699_v24, %v961_v52  ;;  %v1274_v12 = vadd.f32 %v4182_v53, %v3827_v0 }
 0x2bb   :  { %4169 = vmatprep.mubr.msk.f32.mxu1 %vm971_vm8, %v964_v54  ;;  %v1269_v26 = vadd.f32 %v3827_v0, %v1268_v56 }
 0x2bc   :  { %4170 = vmatmul.mubr.msk.f32.vlgmr.msra.gmra.mrb[4].mxu1 %vm971_vm8, %v962_v45  ;;  %v4375_v45 = vpack.c.bf16 %v1535_v44, %v1534_v16 }
 0x2bd   :  { %4172 = vmatprep.mubr.msk.f32.mxu1 %vm971_vm8, %v966_v57  ;;  %4184 = vmatpush3.msra.mxu1 %v3835_v58 }
 0x2be   :  { %4191 = vmatprep.subr.mxu1 %v1310_v59  ;;  %4376 = vmatprep.subr.bf16.mxu0 %v4375_v45 }
 0x2c0   :  { %4173 = vmatmul.mubr.msk.f32.gmra.mrb[6].mxu1 %vm971_vm8, %v960_v55 }
 0x38f   :  { %v4171_v3 = vpop.f32.mrb[4].mxu1 }
 0x390   :  { %v1174_v4 = vadd.f32 %v4171_v3, %v3826_v63  ;;  %v1147_v8 = vpop.f32.mrb[5].mxu1 }
 0x391   :  { %v1173_v9 = vadd.f32 %v3826_v63, %v1147_v8 }
 0x392   :  { %v1178_v13 = vmax.f32 %v1174_v4, 0.0 }
 0x393   :  { %v1177_v15 = vmax.f32 %v1173_v9, 0.0  ;;  %v4174_v18 = vpop.f32.mrb[6].mxu1 }
 0x394   :  { %v1278_v19 = vadd.f32 %v1264_v10, %v1178_v13  ;;  %v1176_v6 = vadd.f32 %v4174_v18, %v3826_v63  ;;  %v1157_v21 = vpop.f32.mrb[7].mxu1  ;;  %v1850_v18 = vld [vmem:[%s3754_s5] sm:$0xff] }
 0x395   :  { %v1277_v5 = vadd.f32 %v1259_v14, %v1177_v15  ;;  %v1175_v22 = vadd.f32 %v3826_v63, %v1157_v21  ;;  %v3855_v21 = vld [vmem:[%s3751_s9] ss:$0 sm:$0xff]  ;;  %s4550_s9 = smov 24  }
 0x396   :  { %v1282_v11 = vmax.f32 %v1278_v19, 0.0  ;;  %v1180_v25 = vmax.f32 %v1176_v6, 0.0  ;;  %v1851_v19 = vld [vmem:[%s3754_s5 + $0x8] sm:$0xff]  ;;  %s4549_s5 = smov 40   ;;  %s4878_s12 = sld [smem:[%s5084_s0 + %s4550_s9]]  }
 0x397   :  { %v1281_v27 = vmax.f32 %v1277_v5, 0.0  ;;  %v1179_v28 = vmax.f32 %v1175_v22, 0.0  ;;  %v4379_v6 = vpack.c.bf16 %v1851_v19, %v1850_v18  ;;  %v3856_v5 = vld [vmem:[%s3753_s13] ss:$0 sm:$0xff]  ;;  %s3776_s8 = sld [smem:[%s5084_s0 + %s4549_s5]]   ;;  %v1957_v18 = vld [vmem:[%s3737_s4 + $0x8] sm:$0xff]  ;;  %v1958_v19 = vld [vmem:[%s3737_s4 + $0x10] sm:$0xff] }
 0x398   :  { %v1298_v29 = vrot.slane %v1282_v11, 4  ;;  %v1280_v30 = vadd.f32 %v1274_v12, %v1180_v25  ;;  %s4551_s13 = smov 21   ;;  %s4564_s5 = smov 37  }
 0x399   :  { %v1297_v31 = vrot.slane %v1281_v27, 4  ;;  %v1279_v32 = vadd.f32 %v1269_v26, %v1179_v28  ;;  %4185 = vmatprep.mubr.msk.f32.mxu1 %vm971_vm8, %v1281_v27  ;;  %s3757_s16 = sld [smem:[%s5084_s0 + %s4551_s13]]   ;;  %s4565_s9 = smov 35  }
 0x39a   :  { %v1284_v34 = vmax.f32 %v1280_v30, 0.0  ;;  %4186 = vmatmul.mubr.msk.f32.vlgmr.msra.gmra.mrb[8].mxu1 %vm971_vm8, %v1282_v11  ;;  %s4566_s13 = smov 38  }
 0x39b   :  { %v1283_v35 = vmax.f32 %v1279_v32, 0.0  ;;  %4192 = vmatpush3.msra.mxu1 %v1310_v59  ;;  %v1304_v36 = vsel %vm1301_vm9, %v1297_v31, %v1298_v29 }
 0x39c   :  { %v1300_v37 = vrot.slane %v1284_v34, 4  ;;  %4219 = vmatprep.subr.mxu1 %v1749_v33 }
 0x39d   :  { %v1299_v39 = vrot.slane %v1283_v35, 4  ;;  %4188 = vmatprep.mubr.msk.f32.mxu1 %vm971_vm8, %v1283_v35 }
 0x39e   :  { %4189 = vmatmul.mubr.msk.f32.gmra.mrb[10].mxu1 %vm971_vm8, %v1284_v34  ;;  %v1305_v7 = vsel %vm1301_vm9, %v1300_v37, %v1297_v31 }
 0x39f   :  { %v1306_v40 = vmul.f32 %v4768_v38, %v1305_v7  ;;  %v1303_v41 = vsel %vm1301_vm9, %v1298_v29, %v1299_v39  ;;  %v1302_v42 = vsel %vm1301_vm9, %v1299_v39, %v1300_v37 }
 0x3a0   :  { %v1308_v43 = vmul.f32 %v4772_v2, %v1303_v41 }
 0x3a1   :  { %4193 = vmatprep.mubr.msk.f32.mxu1 %vm971_vm8, %v1306_v40 }
 0x3a2   :  { %4194 = vmatmul.mubr.msk.f32.vlgmr.msra.gmra.mrb[8].mxu1 %vm971_vm8, %v1304_v36 }
 0x3a3   :  { %4196 = vmatprep.mubr.msk.f32.mxu1 %vm971_vm8, %v1308_v43  ;;  %4220 = vmatpush3.msra.mxu1 %v1749_v33 }
 0x3a6   :  { %4197 = vmatmul.mubr.msk.f32.gmra.mrb[10].mxu1 %vm971_vm8, %v1302_v42 }
 0x3a7   :  { %4221 = vmatprep.mubr.msk.f32.mxu1 %vm971_vm8, %v1281_v27 }
 0x3aa   :  { %4222 = vmatmul.mubr.msk.f32.vlgmr.msra.gmra.mrb[12].mxu1 %vm971_vm8, %v1282_v11 }
 0x3ab   :  { %4224 = vmatprep.mubr.msk.f32.mxu1 %vm971_vm8, %v1283_v35 }
 0x3ae   :  { %4225 = vmatmul.mubr.msk.f32.gmra.mrb[14].mxu1 %vm971_vm8, %v1284_v34 }
 0x475   :  { %v4195_v47 = vpop.f32.mrb[8].mxu1 }
 0x476   :  { %v1515_v48 = vadd.f32 %v4195_v47, %v3844_v46  ;;  %v1488_v49 = vpop.f32.mrb[9].mxu1 }
 0x477   :  { %v1514_v50 = vadd.f32 %v3844_v46, %v1488_v49 }
 0x478   :  { %v1519_v51 = vmax.f32 %v1515_v48, 0.0 }
 0x479   :  { %v1518_v52 = vmax.f32 %v1514_v50, 0.0  ;;  %v4198_v53 = vpop.f32.mrb[10].mxu1 }
 0x47a   :  { %v1523_v54 = vrot.slane %v1519_v51, 4  ;;  %v1517_v55 = vadd.f32 %v4198_v53, %v3844_v46  ;;  %v1498_v56 = vpop.f32.mrb[11].mxu1 }
 0x47b   :  { %v1522_v57 = vrot.slane %v1518_v52, 4  ;;  %v1516_v58 = vadd.f32 %v3844_v46, %v1498_v56  ;;  %4203 = vmatprep.mubr.msk.f32.mxu0 %vm1539_vm12, %v1518_v52 }
 0x47c   :  { %v1521_v59 = vmax.f32 %v1517_v55, 0.0  ;;  %4204 = vmatmul.mubr.msk.f32.vlgmr.msra.gmra.mrb[12].mxu0 %vm1539_vm12, %v1519_v51 }
 0x47d   :  { %v1528_v60 = vsel %vm1301_vm9, %v1522_v57, %v1523_v54  ;;  %v1520_v61 = vmax.f32 %v1516_v58, 0.0  ;;  %4378 = vmatpush3.bf16.msra.mxu0 %v4375_v45  ;;  %v4223_v62 = vpop.f32.mrb[12].mxu1  ;;  %v3861_v45 = vld [vmem:[%s3755_s17] ss:$0 sm:$0xff]  ;;  %s4552_s17 = smov 23  }
 0x47e   :  { %v1525_v63 = vrot.slane %v1521_v59, 4  ;;  %v1823_v0 = vpop.f32.mrb[13].mxu1  ;;  %4380 = vmatprep.subr.bf16.mxu0 %v4379_v6  ;;  %v1829_v26 = vadd.f32 %v4223_v62, %v3856_v5  ;;  %s3759_s20 = sld [smem:[%s5084_s0 + %s4552_s17]]  }
 0x47f   :  { %v1524_v3 = vrot.slane %v1520_v61, 4  ;;  %4206 = vmatprep.mubr.msk.f32.mxu0 %vm1539_vm12, %v1520_v61  ;;  %v1824_v28 = vadd.f32 %v3856_v5, %v1823_v0  ;;  %v1996_v61 = vld [vmem:[%s3756_s25] sm:$0xf]  ;;  %s4554_s25 = smov 28  }
 0x480   :  { %v1529_v4 = vsel %vm1301_vm9, %v1525_v63, %v1522_v57  ;;  %4207 = vmatmul.mubr.msk.f32.gmra.mrb[14].mxu0 %vm1539_vm12, %v1521_v59  ;;  %4237 = vmatprep.subr.msk.mxu1 %vm2017_vm14, %v1996_v61  ;;  %s4948_s28 = sld [smem:[%s5084_s0 + %s4554_s25]]  }
 0x481   :  { %v1527_v8 = vsel %vm1301_vm9, %v1523_v54, %v1524_v3  ;;  %v4226_v9 = vpop.f32.mrb[14].mxu1  ;;  %v1530_v10 = vmul.f32 %v4768_v38, %v1529_v4  ;;  %v1526_v13 = vsel %vm1301_vm9, %v1524_v3, %v1525_v63  ;;  %4238 = vmatpush3.msk.msra.mxu1 %vm2017_vm14, %v1996_v61 }
 0x482   :  { %v1833_v14 = vpop.f32.mrb[15].mxu1  ;;  %v1532_v15 = vmul.f32 %v4772_v2, %v1527_v8  ;;  %v1839_v36 = vadd.f32 %v4226_v9, %v3856_v5  ;;  %v3872_v8 = vld [vmem:[%s4851_s30 + $0x10] sm:$0xff]  ;;  %v3873_v9 = vld [vmem:[%s4851_s30 + $0x18] sm:$0xff] }
 0x483   :  { %4213 = vmatprep.mubr.msk.f32.mxu0 %vm1539_vm12, %v1530_v10  ;;  %v1834_v39 = vadd.f32 %v3856_v5, %v1833_v14  ;;  %v4383_v10 = vpack.c.bf16 %v3873_v9, %v3872_v8 }
 0x484   :  { %4214 = vmatmul.mubr.msk.f32.vlgmr.msra.gmra.mrb[12].mxu0 %vm1539_vm12, %v1528_v60  ;;  %v3882_v61 = vld [vmem:[%s3759_s20] ss:$0 sm:$0xff] }
 0x485   :  { %4216 = vmatprep.mubr.msk.f32.mxu0 %vm1539_vm12, %v1532_v15  ;;  %4382 = vmatpush3.bf16.msra.mxu0 %v4379_v6 }
 0x486   :  { %4384 = vmatprep.subr.bf16.mxu0 %v4383_v10 }
 0x488   :  { %4217 = vmatmul.mubr.msk.f32.gmra.mrb[14].mxu0 %vm1539_vm12, %v1526_v13  ;;  %v1956_v13 = vld [vmem:[%s3737_s4] sm:$0xff] }
 0x557   :  { %v4215_v22 = vpop.f32.mrb[12].mxu0 }
 0x558   :  { %v1742_v12 = vadd.f32 %v4215_v22, %v3855_v21  ;;  %v1715_v11 = vpop.f32.mrb[13].mxu0 }
 0x559   :  { %v1741_v25 = vadd.f32 %v3855_v21, %v1715_v11  ;;  %v1959_v11 = vld [vmem:[%s3737_s4 + $0x18] sm:$0xff]  ;;  %s3772_s4 = sld [smem:[%s5084_s0 + %s4563_s1]]  }
 0x55a   :  { %v1746_v27 = vmax.f32 %v1742_v12, 0.0 }
 0x55b   :  { %v1745_v29 = vmax.f32 %v1741_v25, 0.0  ;;  %v4218_v30 = vpop.f32.mrb[14].mxu0 }
 0x55c   :  { %v1843_v31 = vadd.f32 %v1829_v26, %v1746_v27  ;;  %v1744_v32 = vadd.f32 %v4218_v30, %v3855_v21  ;;  %v1725_v33 = vpop.f32.mrb[15].mxu0 }
 0x55d   :  { %v1842_v34 = vadd.f32 %v1824_v28, %v1745_v29  ;;  %v1743_v35 = vadd.f32 %v3855_v21, %v1725_v33 }
 0x55e   :  { %v1748_v37 = vmax.f32 %v1744_v32, 0.0  ;;  %v1847_v41 = vmax.f32 %v1843_v31, 0.0 }
 0x55f   :  { %v1846_v7 = vmax.f32 %v1842_v34, 0.0  ;;  %v1747_v40 = vmax.f32 %v1743_v35, 0.0  ;;  %v2118_v34 = vld [vmem:[%s4851_s30] sm:$0xff]  ;;  %v2119_v35 = vld [vmem:[%s4851_s30 + $0x8] sm:$0xff]  ;;  %s3767_s30 = sld [smem:[%s5084_s0 + %s4562_s27]]  }
 0x560   :  { %v1845_v42 = vadd.f32 %v1839_v36, %v1748_v37  ;;  %v4387_v36 = vpack.c.bf16 %v2119_v35, %v2118_v34  ;;  %v3883_v37 = vld [vmem:[%s4878_s12 + $0x10] sm:$0xff] }
 0x561   :  { %v1844_v43 = vadd.f32 %v1834_v39, %v1747_v40  ;;  %4231 = vmatprep.mubr.msk.f32.mxu0 %vm1539_vm12, %v1846_v7  ;;  %v3884_v39 = vld [vmem:[%s4878_s12 + $0x18] sm:$0xff]  ;;  %v3866_v40 = vld [vmem:[%s3757_s16] ss:$0 sm:$0xff]  ;;  %s3774_s16 = sld [smem:[%s5084_s0 + %s4566_s13]]  }
 0x562   :  { %4232 = vmatmul.mubr.msk.f32.vlgmr.msra.gmra.mrb[16].mxu0 %vm1539_vm12, %v1847_v41  ;;  %v1849_v44 = vmax.f32 %v1845_v42, 0.0  ;;  %v4391_v7 = vpack.c.bf16 %v3884_v39, %v3883_v37 }
 0x563   :  { %v1848_v16 = vmax.f32 %v1844_v43, 0.0  ;;  %4386 = vmatpush3.bf16.msra.mxu0 %v4383_v10 }
 0x564   :  { %4388 = vmatprep.subr.bf16.mxu0 %v4387_v36  ;;  %4392 = vmatprep.subr.bf16.mxu1 %v4391_v7 }
 0x565   :  { %4234 = vmatprep.mubr.msk.f32.mxu0 %vm1539_vm12, %v1848_v16 }
 0x566   :  { %4235 = vmatmul.mubr.msk.f32.gmra.mrb[18].mxu0 %vm1539_vm12, %v1849_v44 }
 0x635   :  { %v4233_v46 = vpop.f32.mrb[16].mxu0 }
 0x636   :  { %v4833_v47 = vadd.f32 %v4233_v46, %v3861_v45  ;;  %v1937_v48 = vpop.f32.mrb[17].mxu0 }
 0x637   :  { %v1938_v49 = vadd.f32 %v3861_v45, %v1937_v48 }
 0x638   :  { %v1961_v50 = vmul.f32 0.5, %v4833_v47  ;;  %3702 = vst.msk [vmem:[%s3775_s21 + $0x8] sm:$0xff] %vm2004_vm13, %v4833_v47 }
 0x639   :  { %v1960_v51 = vmul.f32 0.5, %v1938_v49  ;;  %3701 = vst.msk [vmem:[%s3775_s21] sm:$0xff] %vm2004_vm13, %v1938_v49  ;;  %v4236_v52 = vpop.f32.mrb[18].mxu0 }
 0x63a   :  { %v4839_v53 = vadd.f32 %v4236_v52, %v3861_v45  ;;  %v1947_v54 = vpop.f32.mrb[19].mxu0  ;;  %v1966_v57 = vmul.f32 1.442695, %v1961_v50 }
 0x63b   :  { %v1964_v55 = vmul.f32 1.442695, %v1960_v51  ;;  %v1948_v56 = vadd.f32 %v3861_v45, %v1947_v54 }
 0x63c   :  { %3704 = vst.msk [vmem:[%s3775_s21 + $0x18] sm:$0xff] %vm2004_vm13, %v4839_v53  ;;  %v1963_v58 = vmul.f32 0.5, %v4839_v53 }
 0x63d   :  { %4501 = vpow2.f32 %v1964_v55  ;;  %v1962_v59 = vmul.f32 0.5, %v1948_v56  ;;  %3703 = vst.msk [vmem:[%s3775_s21 + $0x10] sm:$0xff] %vm2004_vm13, %v1948_v56  ;;  %s4553_s21 = smov 26  }
 0x63e   :  { %4503 = vpow2.f32 %v1966_v57  ;;  %v1970_v62 = vmul.f32 1.442695, %v1963_v58  ;;  %v2344_v58 = vld [vmem:[%s4878_s12] sm:$0xff]  ;;  %s3762_s24 = sld [smem:[%s5084_s0 + %s4553_s21]]  }
 0x63f   :  { %v1968_v60 = vmul.f32 1.442695, %v1962_v59  ;;  %v2345_v59 = vld [vmem:[%s4878_s12 + $0x8] sm:$0xff]  ;;  %s3771_s12 = sld [smem:[%s5084_s0 + %s4565_s9]]  }
 0x641   :  { %4505 = vpow2.f32 %v1968_v60  ;;  %v4395_v60 = vpack.c.bf16 %v2345_v59, %v2344_v58 }
 0x642   :  { %4507 = vpow2.f32 %v1970_v62 }
 0x647   :  { %v4502_v63 = vpop.eup %4501 }
 0x648   :  { %1976 = vrot.lane.b32.xlu0 %v4502_v63, %s4546_s26  ;;  %v4504_v0 = vpop.eup %4503 }
 0x64b   :  { %v4506_v3 = vpop.eup %4505 }
 0x64c   :  { %1978 = vrot.lane.b32.xlu0 %v4504_v0, %s4546_s26  ;;  %1980 = vrot.lane.b32.xlu1 %v4506_v3, %s4546_s26  ;;  %v4508_v4 = vpop.eup %4507 }
 0x650   :  { %3709 = vrot.lane.b32.xlu0 %v1938_v49, %s4546_s26  ;;  %1982 = vrot.lane.b32.xlu1 %v4508_v4, %s4546_s26 }
 0x654   :  { %3713 = vrot.lane.b32.xlu0 %v1948_v56, %s4546_s26  ;;  %3711 = vrot.lane.b32.xlu1 %v4833_v47, %s4546_s26 }
 0x658   :  { %3715 = vrot.lane.b32.xlu1 %v4839_v53, %s4546_s26  ;;  %s3765_s26 = sld [smem:[%s5084_s0 + %s4561_s23]]  }
 0x6ba   :  { %v1977_v14 = vpop.permute.xlu0 %1976 }
 0x6bb   :  { %v1988_v15 = vmul.f32 %v1977_v14, %v1956_v13 }
 0x6bd   :  { %v1992_v6 = vadd.f32 %v1988_v15, %v1938_v49 }
 0x6be   :  { %v1979_v21 = vpop.permute.xlu0 %1978  ;;  %v1981_v5 = vpop.permute.xlu1 %1980 }
 0x6bf   :  { %v1989_v22 = vmul.f32 %v1979_v21, %v1957_v18  ;;  %v1990_v12 = vmul.f32 %v1981_v5, %v1958_v19  ;;  %4239 = vmatprep.mubr.msk.f32.mxu1 %vm2004_vm13, %v1992_v6 }
 0x6c1   :  { %v1993_v25 = vadd.f32 %v1989_v22, %v4833_v47  ;;  %v1994_v26 = vadd.f32 %v1990_v12, %v1948_v56 }
 0x6c2   :  { %v3710_v27 = vpop.permute.xlu0 %3709  ;;  %v1983_v28 = vpop.permute.xlu1 %1982 }
 0x6c3   :  { %3721 = vst.msk [vmem:[%s3776_s8] sm:$0xff] %vm2004_vm13, %v3710_v27  ;;  %v1991_v29 = vmul.f32 %v1983_v28, %v1959_v11  ;;  %4240 = vmatmul.mubr.msk.f32.vlgmr.msra.gmra.mrb[16].mxu1 %vm2004_vm13, %v1993_v25  ;;  %v3894_v28 = vld [vmem:[%s3762_s24 + $0x10] sm:$0xff] }
 0x6c4   :  { %4242 = vmatprep.mubr.msk.f32.mxu1 %vm2004_vm13, %v1994_v26  ;;  %4394 = vmatpush3.bf16.msra.mxu1 %v4391_v7 }
 0x6c5   :  { %v1995_v30 = vadd.f32 %v1991_v29, %v4839_v53  ;;  %4396 = vmatprep.subr.bf16.mxu1 %v4395_v60 }
 0x6c6   :  { %v3714_v31 = vpop.permute.xlu0 %3713  ;;  %v3712_v32 = vpop.permute.xlu1 %3711 }
 0x6c7   :  { %3723 = vst.msk [vmem:[%s3776_s8 + $0x10] sm:$0xff] %vm2004_vm13, %v3714_v31  ;;  %3722 = vst.msk [vmem:[%s3776_s8 + $0x8] sm:$0xff] %vm2004_vm13, %v3712_v32  ;;  %4243 = vmatmul.mubr.msk.f32.gmra.mrb[18].mxu1 %vm2004_vm13, %v1995_v30  ;;  %v2578_v30 = vld [vmem:[%s3762_s24] sm:$0xff]  ;;  %v3905_v32 = vld [vmem:[%s4948_s28 + $0x8] sm:$0xff] }
 0x6ca   :  { %v3716_v33 = vpop.permute.xlu1 %3715 }
 0x6cb   :  { %3724 = vst.msk [vmem:[%s3776_s8 + $0x18] sm:$0xff] %vm2004_vm13, %v3716_v33  ;;  %v3893_v33 = vld [vmem:[%s3761_s2] ss:$0 sm:$0xff]  ;;  %s3773_s8 = sld [smem:[%s5084_s0 + %s4564_s5]]  }
 0x796   :  { %v4241_v41 = vpop.f32.mrb[16].mxu1 }
 0x797   :  { %v2087_v42 = vpop.f32.mrb[17].mxu1  ;;  %v4887_v16 = vadd.f32 %v4241_v41, %v3866_v40 }
 0x798   :  { %v4885_v43 = vadd.f32 %v3866_v40, %v2087_v42 }
 0x799   :  { %v2107_v50 = vrot.slane %v4887_v16, 7 }
 0x79a   :  { %v4244_v44 = vpop.f32.mrb[18].mxu1  ;;  %4249 = vmatprep.mubr.msk.f32.mxu0 %vm1539_vm12, %v4885_v43  ;;  %v2106_v48 = vrot.slane %v4885_v43, 7 }
 0x79b   :  { %v4891_v45 = vadd.f32 %v4244_v44, %v3866_v40  ;;  %v2097_v46 = vpop.f32.mrb[19].mxu1  ;;  %4250 = vmatmul.mubr.msk.f32.vlgmr.msra.gmra.mrb[20].mxu0 %vm1539_vm12, %v4887_v16 }
 0x79c   :  { %v4895_v47 = vadd.f32 %v3866_v40, %v2097_v46  ;;  %4390 = vmatpush3.bf16.msra.mxu0 %v4387_v36  ;;  %v2112_v56 = vsel %vm246_vm3, %v2106_v48, %v2107_v50 }
 0x79d   :  { %v2109_v49 = vrot.slane %v4891_v45, 7 }
 0x79e   :  { %v2108_v51 = vrot.slane %v4895_v47, 7  ;;  %4252 = vmatprep.mubr.msk.f32.mxu0 %vm1539_vm12, %v4895_v47 }
 0x79f   :  { %4253 = vmatmul.mubr.msk.f32.gmra.mrb[22].mxu0 %vm1539_vm12, %v4891_v45  ;;  %v2113_v52 = vsel %vm246_vm3, %v2109_v49, %v2106_v48 }
 0x7a0   :  { %v2114_v53 = vmul.f32 %v4610_v17, %v2113_v52  ;;  %v2111_v54 = vsel %vm246_vm3, %v2107_v50, %v2108_v51  ;;  %v2110_v57 = vsel %vm246_vm3, %v2108_v51, %v2109_v49  ;;  %v3016_v49 = vld [vmem:[%s3766_s6] sm:$0xff]  ;;  %v3017_v50 = vld [vmem:[%s3766_s6 + $0x8] sm:$0xff] }
 0x7a1   :  { %v2116_v55 = vmul.f32 %v4623_v20, %v2111_v54 }
 0x7a2   :  { %4259 = vmatprep.mubr.msk.f32.mxu0 %vm1539_vm12, %v2114_v53 }
 0x7a3   :  { %4260 = vmatmul.mubr.msk.f32.vlgmr.msra.gmra.mrb[20].mxu0 %vm1539_vm12, %v2112_v56 }
 0x7a4   :  { %4262 = vmatprep.mubr.msk.f32.mxu0 %vm1539_vm12, %v2116_v55 }
 0x7a7   :  { %4263 = vmatmul.mubr.msk.f32.gmra.mrb[22].mxu0 %vm1539_vm12, %v2110_v57  ;;  %v4407_v57 = vpack.c.bf16 %v3017_v50, %v3016_v49 }
 0x876   :  { %v4261_v62 = vpop.f32.mrb[20].mxu0 }
 0x877   :  { %v2325_v63 = vadd.f32 %v4261_v62, %v3882_v61  ;;  %v2298_v0 = vpop.f32.mrb[21].mxu0 }
 0x878   :  { %v2324_v3 = vadd.f32 %v3882_v61, %v2298_v0 }
 0x879   :  { %v2329_v4 = vmax.f32 %v2325_v63, 0.0 }
 0x87a   :  { %v2328_v8 = vmax.f32 %v2324_v3, 0.0  ;;  %v4264_v9 = vpop.f32.mrb[22].mxu0 }
 0x87b   :  { %v2333_v10 = vrot.slane %v2329_v4, 7  ;;  %v2327_v13 = vadd.f32 %v4264_v9, %v3882_v61  ;;  %v2308_v14 = vpop.f32.mrb[23].mxu0 }
 0x87c   :  { %v2332_v15 = vrot.slane %v2328_v8, 7  ;;  %v2326_v18 = vadd.f32 %v3882_v61, %v2308_v14  ;;  %4269 = vmatprep.mubr.msk.f32.mxu1 %vm1539_vm12, %v2328_v8  ;;  %v3904_v8 = vld [vmem:[%s3763_s10] ss:$0 sm:$0xff] }
 0x87d   :  { %v2331_v19 = vmax.f32 %v2327_v13, 0.0  ;;  %4270 = vmatmul.mubr.msk.f32.vlgmr.msra.gmra.mrb[20].mxu1 %vm1539_vm12, %v2329_v4  ;;  %v2804_v4 = vld [vmem:[%s4948_s28] sm:$0xff] }
 0x87e   :  { %v2338_v6 = vsel %vm246_vm3, %v2332_v15, %v2333_v10  ;;  %v2330_v21 = vmax.f32 %v2326_v18, 0.0  ;;  %4398 = vmatpush3.bf16.msra.mxu1 %v4395_v60 }
 0x87f   :  { %v2335_v5 = vrot.slane %v2331_v19, 7  ;;  %4305 = vmatprep.subr.mxu1 %v3905_v32 }
 0x880   :  { %v2334_v22 = vrot.slane %v2330_v21, 7  ;;  %4272 = vmatprep.mubr.msk.f32.mxu1 %vm1539_vm12, %v2330_v21 }
 0x881   :  { %v2339_v12 = vsel %vm246_vm3, %v2335_v5, %v2332_v15  ;;  %4273 = vmatmul.mubr.msk.f32.gmra.mrb[22].mxu1 %vm1539_vm12, %v2331_v19 }
 0x882   :  { %v2337_v11 = vsel %vm246_vm3, %v2333_v10, %v2334_v22  ;;  %v2340_v25 = vmul.f32 %v4610_v17, %v2339_v12  ;;  %v2336_v26 = vsel %vm246_vm3, %v2334_v22, %v2335_v5  ;;  %v3895_v17 = vld [vmem:[%s3762_s24 + $0x18] sm:$0xff] }
 0x883   :  { %v2342_v27 = vmul.f32 %v4623_v20, %v2337_v11  ;;  %v4399_v29 = vpack.c.bf16 %v3895_v17, %v3894_v28  ;;  %v2579_v20 = vld [vmem:[%s3762_s24 + $0x8] sm:$0xff] }
 0x884   :  { %4279 = vmatprep.mubr.msk.f32.mxu1 %vm1539_vm12, %v2340_v25  ;;  %v4403_v31 = vpack.c.bf16 %v2579_v20, %v2578_v30 }
 0x885   :  { %4280 = vmatmul.mubr.msk.f32.vlgmr.msra.gmra.mrb[20].mxu1 %vm1539_vm12, %v2338_v6  ;;  %4400 = vmatprep.subr.bf16.mxu0 %v4399_v29 }
 0x886   :  { %4282 = vmatprep.mubr.msk.f32.mxu1 %vm1539_vm12, %v2342_v27  ;;  %4402 = vmatpush3.bf16.msra.mxu0 %v4399_v29 }
 0x887   :  { %4404 = vmatprep.subr.bf16.mxu0 %v4403_v31  ;;  %4306 = vmatpush3.msra.mxu1 %v3905_v32 }
 0x888   :  { %4313 = vmatprep.subr.mxu1 %v2804_v4 }
 0x889   :  { %4283 = vmatmul.mubr.msk.f32.gmra.mrb[22].mxu1 %vm1539_vm12, %v2336_v26 }
 0x958   :  { %v4281_v34 = vpop.f32.mrb[20].mxu1 }
 0x959   :  { %v2551_v35 = vadd.f32 %v4281_v34, %v3893_v33  ;;  %v2524_v36 = vpop.f32.mrb[21].mxu1 }
 0x95a   :  { %v2550_v37 = vadd.f32 %v3893_v33, %v2524_v36  ;;  %v3130_v36 = vld [vmem:[%s3768_s14] sm:$0xff] }
 0x95b   :  { %v2555_v39 = vmax.f32 %v2551_v35, 0.0 }
 0x95c   :  { %v2554_v7 = vmax.f32 %v2550_v37, 0.0  ;;  %v4284_v40 = vpop.f32.mrb[22].mxu1  ;;  %v91_v37 = vstv %s3769_s22 }
 0x95d   :  { %v2559_v41 = vadd.f32 %v2555_v39, %v4887_v16  ;;  %v2553_v42 = vadd.f32 %v4284_v40, %v3893_v33  ;;  %v2534_v44 = vpop.f32.mrb[23].mxu1  ;;  %92 = vst [vmem:[#allocation4] sm:$0x1] %v91_v37  ;;  %v3914_v39 = vld [vmem:[%s3765_s26] ss:$0 sm:$0xff] }
 0x95e   :  { %v2558_v46 = vadd.f32 %v2554_v7, %v4885_v43  ;;  %v2552_v48 = vadd.f32 %v3893_v33, %v2534_v44  ;;  %v3915_v7 = vld [vmem:[%s3767_s30] ss:$0 sm:$0xff] }
 0x95f   :  { %v2563_v51 = vmax.f32 %v2559_v41, 0.0  ;;  %v2557_v52 = vmax.f32 %v2553_v42, 0.0 }
 0x960   :  { %v2562_v53 = vmax.f32 %v2558_v46, 0.0  ;;  %v2556_v54 = vmax.f32 %v2552_v48, 0.0 }
 0x961   :  { %v2567_v55 = vrot.slane %v2563_v51, 6  ;;  %v2561_v56 = vadd.f32 %v2557_v52, %v4891_v45 }
 0x962   :  { %v2566_v58 = vrot.slane %v2562_v53, 6  ;;  %v2560_v59 = vadd.f32 %v2556_v54, %v4895_v47  ;;  %4289 = vmatprep.mubr.msk.f32.mxu0 %vm1539_vm12, %v2562_v53 }
 0x963   :  { %v2565_v16 = vmax.f32 %v2561_v56, 0.0  ;;  %4290 = vmatmul.mubr.msk.f32.vlgmr.msra.gmra.mrb[24].mxu0 %vm1539_vm12, %v2563_v51 }
 0x964   :  { %v2564_v43 = vmax.f32 %v2560_v59, 0.0  ;;  %4406 = vmatpush3.bf16.msra.mxu0 %v4403_v31  ;;  %v2572_v60 = vsel %vm729_vm5, %v2566_v58, %v2567_v55 }
 0x965   :  { %v2569_v61 = vrot.slane %v2565_v16, 6  ;;  %4408 = vmatprep.subr.bf16.mxu0 %v4407_v57 }
 0x966   :  { %v2568_v62 = vrot.slane %v2564_v43, 6  ;;  %4292 = vmatprep.mubr.msk.f32.mxu0 %vm1539_vm12, %v2564_v43 }
 0x967   :  { %4293 = vmatmul.mubr.msk.f32.gmra.mrb[26].mxu0 %vm1539_vm12, %v2565_v16  ;;  %v2573_v45 = vsel %vm729_vm5, %v2569_v61, %v2566_v58 }
 0x968   :  { %v2574_v47 = vmul.f32 %v4694_v23, %v2573_v45  ;;  %v2571_v63 = vsel %vm729_vm5, %v2567_v55, %v2568_v62  ;;  %v2570_v0 = vsel %vm729_vm5, %v2568_v62, %v2569_v61 }
 0x969   :  { %v2576_v3 = vmul.f32 %v4699_v24, %v2571_v63  ;;  %v3572_v63 = vld [vmem:[%s3772_s4] sm:$0xff] }
 0x96a   :  { %4299 = vmatprep.mubr.msk.f32.mxu0 %vm1539_vm12, %v2574_v47 }
 0x96b   :  { %4300 = vmatmul.mubr.msk.f32.vlgmr.msra.gmra.mrb[24].mxu0 %vm1539_vm12, %v2572_v60 }
 0x96c   :  { %4302 = vmatprep.mubr.msk.f32.mxu0 %vm1539_vm12, %v2576_v3  ;;  %4410 = vmatpush3.bf16.msra.mxu0 %v4407_v57 }
 0x96f   :  { %4303 = vmatmul.mubr.msk.f32.gmra.mrb[26].mxu0 %vm1539_vm12, %v2570_v0 }
 0x970   :  { %4325 = vmatprep.mubr.msk.f32.mxu0 %vm1539_vm12, %v2562_v53 }
 0x973   :  { %4326 = vmatmul.mubr.msk.f32.vlgmr.msra.gmra.mrb[28].mxu0 %vm1539_vm12, %v2563_v51 }
 0x974   :  { %4328 = vmatprep.mubr.msk.f32.mxu0 %vm1539_vm12, %v2564_v43 }
 0x977   :  { %4329 = vmatmul.mubr.msk.f32.gmra.mrb[30].mxu0 %vm1539_vm12, %v2565_v16 }
 0xa3e   :  { %v4301_v9 = vpop.f32.mrb[24].mxu0 }
 0xa3f   :  { %v2785_v10 = vadd.f32 %v4301_v9, %v3904_v8  ;;  %v2758_v13 = vpop.f32.mrb[25].mxu0 }
 0xa40   :  { %v2784_v14 = vadd.f32 %v3904_v8, %v2758_v13 }
 0xa41   :  { %v2789_v15 = vmax.f32 %v2785_v10, 0.0 }
 0xa42   :  { %v2788_v18 = vmax.f32 %v2784_v14, 0.0  ;;  %v4304_v19 = vpop.f32.mrb[26].mxu0 }
 0xa43   :  { %v2793_v6 = vrot.slane %v2789_v15, 6  ;;  %v2787_v21 = vadd.f32 %v4304_v19, %v3904_v8  ;;  %v2768_v5 = vpop.f32.mrb[27].mxu0  ;;  %v95_v19 = vstv %s3773_s8 }
 0xa44   :  { %v2792_v22 = vrot.slane %v2788_v18, 6  ;;  %v2786_v12 = vadd.f32 %v3904_v8, %v2768_v5  ;;  %4307 = vmatprep.mubr.msk.f32.mxu1 %vm971_vm8, %v2788_v18  ;;  %96 = vst [vmem:[#allocation6] sm:$0x1] %v95_v19  ;;  %v3929_v5 = vld [vmem:[#allocation4] ss:$0 sm:$0xff] }
 0xa45   :  { %v2791_v11 = vmax.f32 %v2787_v21, 0.0  ;;  %4308 = vmatmul.mubr.msk.f32.vlgmr.msra.gmra.mrb[24].mxu1 %vm971_vm8, %v2789_v15  ;;  %v93_v21 = vstv %s3771_s12 }
 0xa46   :  { %v2798_v25 = vsel %vm729_vm5, %v2792_v22, %v2793_v6  ;;  %v2790_v26 = vmax.f32 %v2786_v12, 0.0  ;;  %4314 = vmatpush3.msra.mxu1 %v2804_v4  ;;  %v4327_v27 = vpop.f32.mrb[28].mxu0  ;;  %94 = vst [vmem:[#allocation5] sm:$0x1] %v93_v21 }
 0xa47   :  { %v2795_v28 = vrot.slane %v2791_v11, 6  ;;  %v3091_v17 = vpop.f32.mrb[29].mxu0  ;;  %v3097_v46 = vadd.f32 %v4327_v27, %v3915_v7 }
 0xa48   :  { %v2794_v29 = vrot.slane %v2790_v26, 6  ;;  %4310 = vmatprep.mubr.msk.f32.mxu1 %vm971_vm8, %v2790_v26  ;;  %v3092_v49 = vadd.f32 %v3915_v7, %v3091_v17 }
 0xa49   :  { %v2799_v30 = vsel %vm729_vm5, %v2795_v28, %v2792_v22  ;;  %4311 = vmatmul.mubr.msk.f32.gmra.mrb[26].mxu1 %vm971_vm8, %v2791_v11 }
 0xa4a   :  { %v2797_v20 = vsel %vm729_vm5, %v2793_v6, %v2794_v29  ;;  %v4330_v31 = vpop.f32.mrb[30].mxu0  ;;  %v2800_v32 = vmul.f32 %v4694_v23, %v2799_v30  ;;  %v2796_v33 = vsel %vm729_vm5, %v2794_v29, %v2795_v28  ;;  %v3920_v23 = vld [vmem:[%s3768_s14 + $0x8] sm:$0xff]  ;;  %v3354_v6 = vld [vmem:[%s5011_s18] sm:$0x1] }
 0xa4b   :  { %v3101_v34 = vpop.f32.mrb[31].mxu0  ;;  %v2802_v35 = vmul.f32 %v4699_v24, %v2797_v20  ;;  %4331 = vmatprep.subr.mxu1 %v3920_v23  ;;  %v3930_v24 = vld [vmem:[%s5011_s18 + $0x1] sm:$0x1]  ;;  %v3107_v57 = vadd.f32 %v4330_v31, %v3915_v7 }
 0xa4c   :  { %4315 = vmatprep.mubr.msk.f32.mxu1 %vm971_vm8, %v2800_v32  ;;  %4347 = vmatprep.subr.msk.mxu0 %vm271_vm0, %v3930_v24  ;;  %v3102_v16 = vadd.f32 %v3915_v7, %v3101_v34 }
 0xa4d   :  { %4316 = vmatmul.mubr.msk.f32.vlgmr.msra.gmra.mrb[24].mxu1 %vm971_vm8, %v2798_v25  ;;  %4348 = vmatpush3.msk.msra.mxu0 %vm271_vm0, %v3930_v24 }
 0xa4e   :  { %4318 = vmatprep.mubr.msk.f32.mxu1 %vm971_vm8, %v2802_v35  ;;  %4332 = vmatpush3.msra.mxu1 %v3920_v23 }
 0xa4f   :  { %4339 = vmatprep.subr.mxu1 %v3130_v36  ;;  %4355 = vmatprep.subr.msk.mxu0 %vm271_vm0, %v3354_v6 }
 0xa51   :  { %4319 = vmatmul.mubr.msk.f32.gmra.mrb[26].mxu1 %vm971_vm8, %v2796_v33 }
 0xb20   :  { %v4317_v40 = vpop.f32.mrb[24].mxu1 }
 0xb21   :  { %v3009_v41 = vadd.f32 %v4317_v40, %v3914_v39  ;;  %v2982_v42 = vpop.f32.mrb[25].mxu1 }
 0xb22   :  { %v3008_v44 = vadd.f32 %v3914_v39, %v2982_v42 }
 0xb23   :  { %v3013_v48 = vmax.f32 %v3009_v41, 0.0 }
 0xb24   :  { %v3012_v50 = vmax.f32 %v3008_v44, 0.0  ;;  %v4320_v51 = vpop.f32.mrb[26].mxu1 }
 0xb25   :  { %v3111_v52 = vadd.f32 %v3097_v46, %v3013_v48  ;;  %v3011_v53 = vadd.f32 %v4320_v51, %v3914_v39  ;;  %v2992_v54 = vpop.f32.mrb[27].mxu1  ;;  %v3941_v46 = vld [vmem:[#allocation5] ss:$0 sm:$0xff]  ;;  %v3942_v48 = vld [vmem:[#allocation6] ss:$0 sm:$0xff] }
 0xb26   :  { %v3110_v55 = vadd.f32 %v3092_v49, %v3012_v50  ;;  %v3010_v56 = vadd.f32 %v3914_v39, %v2992_v54 }
 0xb27   :  { %v3115_v58 = vmax.f32 %v3111_v52, 0.0  ;;  %v3015_v59 = vmax.f32 %v3011_v53, 0.0 }
 0xb28   :  { %v3114_v43 = vmax.f32 %v3110_v55, 0.0  ;;  %v3014_v60 = vmax.f32 %v3010_v56, 0.0 }
 0xb29   :  { %v3119_v61 = vrot.slane %v3115_v58, 4  ;;  %v3113_v62 = vadd.f32 %v3107_v57, %v3015_v59 }
 0xb2a   :  { %v3118_v45 = vrot.slane %v3114_v43, 4  ;;  %v3112_v47 = vadd.f32 %v3102_v16, %v3014_v60  ;;  %4333 = vmatprep.mubr.msk.f32.mxu1 %vm971_vm8, %v3114_v43 }
 0xb2b   :  { %v3117_v0 = vmax.f32 %v3113_v62, 0.0  ;;  %4334 = vmatmul.mubr.msk.f32.vlgmr.msra.gmra.mrb[28].mxu1 %vm971_vm8, %v3115_v58 }
 0xb2c   :  { %v3116_v3 = vmax.f32 %v3112_v47, 0.0  ;;  %4340 = vmatpush3.msra.mxu1 %v3130_v36  ;;  %v3124_v4 = vsel %vm1301_vm9, %v3118_v45, %v3119_v61 }
 0xb2d   :  { %v3121_v8 = vrot.slane %v3117_v0, 4  ;;  %4363 = vmatprep.subr.mxu1 %v3572_v63 }
 0xb2e   :  { %v3120_v9 = vrot.slane %v3116_v3, 4  ;;  %4336 = vmatprep.mubr.msk.f32.mxu1 %vm971_vm8, %v3116_v3 }
 0xb2f   :  { %4337 = vmatmul.mubr.msk.f32.gmra.mrb[30].mxu1 %vm971_vm8, %v3117_v0  ;;  %v3125_v10 = vsel %vm1301_vm9, %v3121_v8, %v3118_v45 }
 0xb30   :  { %v3126_v13 = vmul.f32 %v4768_v38, %v3125_v10  ;;  %v3123_v14 = vsel %vm1301_vm9, %v3119_v61, %v3120_v9  ;;  %v3122_v15 = vsel %vm1301_vm9, %v3120_v9, %v3121_v8 }
 0xb31   :  { %v3128_v18 = vmul.f32 %v4772_v2, %v3123_v14 }
 0xb32   :  { %4341 = vmatprep.mubr.msk.f32.mxu1 %vm971_vm8, %v3126_v13 }
 0xb33   :  { %4342 = vmatmul.mubr.msk.f32.vlgmr.msra.gmra.mrb[28].mxu1 %vm971_vm8, %v3124_v4 }
 0xb34   :  { %4344 = vmatprep.mubr.msk.f32.mxu1 %vm971_vm8, %v3128_v18  ;;  %4364 = vmatpush3.msra.mxu1 %v3572_v63 }
 0xb37   :  { %4345 = vmatmul.mubr.msk.f32.gmra.mrb[30].mxu1 %vm971_vm8, %v3122_v15 }
 0xb38   :  { %4365 = vmatprep.mubr.msk.f32.mxu1 %vm971_vm8, %v3114_v43 }
 0xb3b   :  { %4366 = vmatmul.mubr.msk.f32.vlgmr.msra.gmra.mrb[32].mxu1 %vm971_vm8, %v3115_v58 }
 0xb3c   :  { %4368 = vmatprep.mubr.msk.f32.mxu1 %vm971_vm8, %v3116_v3 }
 0xb3f   :  { %4369 = vmatmul.mubr.msk.f32.gmra.mrb[34].mxu1 %vm971_vm8, %v3117_v0 }
 0xc06   :  { %v4343_v22 = vpop.f32.mrb[28].mxu1 }
 0xc07   :  { %v3335_v12 = vadd.f32 %v4343_v22, %v3929_v5  ;;  %v3308_v11 = vpop.f32.mrb[29].mxu1 }
 0xc08   :  { %v3334_v25 = vadd.f32 %v3929_v5, %v3308_v11 }
 0xc09   :  { %v3339_v26 = vmax.f32 %v3335_v12, 0.0 }
 0xc0a   :  { %v3338_v27 = vmax.f32 %v3334_v25, 0.0  ;;  %v4346_v28 = vpop.f32.mrb[30].mxu1 }
 0xc0b   :  { %v3343_v17 = vrot.slane %v3339_v26, 4  ;;  %v3337_v29 = vadd.f32 %v4346_v28, %v3929_v5  ;;  %v3318_v30 = vpop.f32.mrb[31].mxu1 }
 0xc0c   :  { %v3342_v20 = vrot.slane %v3338_v27, 4  ;;  %v3336_v31 = vadd.f32 %v3929_v5, %v3318_v30  ;;  %4349 = vmatprep.mubr.msk.f32.mxu0 %vm258_vm1, %v3338_v27 }
 0xc0d   :  { %v3341_v32 = vmax.f32 %v3337_v29, 0.0  ;;  %4350 = vmatmul.mubr.msk.f32.vlgmr.msra.gmra.mrb[32].mxu0 %vm258_vm1, %v3339_v26 }
 0xc0e   :  { %v3348_v33 = vsel %vm1301_vm9, %v3342_v20, %v3343_v17  ;;  %v3340_v34 = vmax.f32 %v3336_v31, 0.0  ;;  %4356 = vmatpush3.msk.msra.mxu0 %vm271_vm0, %v3354_v6  ;;  %v4367_v35 = vpop.f32.mrb[32].mxu1 }
 0xc0f   :  { %v3345_v23 = vrot.slane %v3341_v32, 4  ;;  %v3646_v36 = vpop.f32.mrb[33].mxu1  ;;  %v3652_v52 = vadd.f32 %v4367_v35, %v3942_v48 }
 0xc10   :  { %v3344_v24 = vrot.slane %v3340_v34, 4  ;;  %4352 = vmatprep.mubr.msk.f32.mxu0 %vm258_vm1, %v3340_v34  ;;  %v3647_v53 = vadd.f32 %v3942_v48, %v3646_v36 }
 0xc11   :  { %v3349_v37 = vsel %vm1301_vm9, %v3345_v23, %v3342_v20  ;;  %4353 = vmatmul.mubr.msk.f32.gmra.mrb[34].mxu0 %vm258_vm1, %v3341_v32 }
 0xc12   :  { %v3347_v39 = vsel %vm1301_vm9, %v3343_v17, %v3344_v24  ;;  %v4370_v7 = vpop.f32.mrb[34].mxu1  ;;  %v3350_v40 = vmul.f32 %v4768_v38, %v3349_v37  ;;  %v3346_v41 = vsel %vm1301_vm9, %v3344_v24, %v3345_v23 }
 0xc13   :  { %v3656_v42 = vpop.f32.mrb[35].mxu1  ;;  %v3352_v44 = vmul.f32 %v4772_v2, %v3347_v39  ;;  %v3662_v16 = vadd.f32 %v4370_v7, %v3942_v48 }
 0xc14   :  { %4357 = vmatprep.mubr.msk.f32.mxu0 %vm258_vm1, %v3350_v40  ;;  %v3657_v61 = vadd.f32 %v3942_v48, %v3656_v42 }
 0xc15   :  { %4358 = vmatmul.mubr.msk.f32.vlgmr.msra.gmra.mrb[32].mxu0 %vm258_vm1, %v3348_v33 }
 0xc16   :  { %4360 = vmatprep.mubr.msk.f32.mxu0 %vm258_vm1, %v3352_v44 }
 0xc19   :  { %4361 = vmatmul.mubr.msk.f32.gmra.mrb[34].mxu0 %vm258_vm1, %v3346_v41 }
 0xce8   :  { %v4359_v49 = vpop.f32.mrb[32].mxu0 }
 0xce9   :  { %v3565_v50 = vadd.f32 %v4359_v49, %v3941_v46  ;;  %v3538_v51 = vpop.f32.mrb[33].mxu0 }
 0xcea   :  { %v3564_v38 = vadd.f32 %v3941_v46, %v3538_v51 }
 0xceb   :  { %v3569_v1 = vmax.f32 %v3565_v50, 0.0 }
 0xcec   :  { %v3568_v54 = vmax.f32 %v3564_v38, 0.0  ;;  %v4362_v55 = vpop.f32.mrb[34].mxu0 }
 0xced   :  { %v3666_v2 = vadd.f32 %v3652_v52, %v3569_v1  ;;  %v3567_v56 = vadd.f32 %v4362_v55, %v3941_v46  ;;  %v3548_v57 = vpop.f32.mrb[35].mxu0 }
 0xcee   :  { %v3665_v58 = vadd.f32 %v3647_v53, %v3568_v54  ;;  %v3566_v59 = vadd.f32 %v3941_v46, %v3548_v57 }
 0xcef   :  { %v3670_v43 = vmax.f32 %v3666_v2, 0.0  ;;  %v3571_v60 = vmax.f32 %v3567_v56, 0.0 }
 0xcf0   :  { %v3669_v62 = vmax.f32 %v3665_v58, 0.0  ;;  %v3570_v45 = vmax.f32 %v3566_v59, 0.0 }
 0xcf1   :  { %v3948_v47 = vmul.f32 -1.442695, %v3670_v43  ;;  %v3668_v63 = vadd.f32 %v3662_v16, %v3571_v60 }
 0xcf2   :  { %v3947_v0 = vmul.f32 -1.442695, %v3669_v62  ;;  %v3667_v3 = vadd.f32 %v3657_v61, %v3570_v45 }
 0xcf3   :  { %4509 = vpow2.f32 %v3948_v47  ;;  %v3672_v4 = vmax.f32 %v3668_v63, 0.0 }
 0xcf4   :  { %4511 = vpow2.f32 %v3947_v0  ;;  %v3671_v8 = vmax.f32 %v3667_v3, 0.0 }
 0xcf5   :  { %v3950_v9 = vmul.f32 -1.442695, %v3672_v4 }
 0xcf6   :  { %v3949_v10 = vmul.f32 -1.442695, %v3671_v8 }
 0xcf7   :  { %4513 = vpow2.f32 %v3950_v9 }
 0xcf8   :  { %4515 = vpow2.f32 %v3949_v10 }
 0xcfd   :  { %v4510_v13 = vpop.eup %4509 }
 0xcfe   :  { %v4512_v14 = vpop.eup %4511  ;;  %v3686_v15 = vadd.f32 1.0, %v4510_v13 }
 0xcff   :  { %v3685_v18 = vadd.f32 1.0, %v4512_v14 }
 0xd00   :  { %4517 = vrcp.f32 %v3686_v15 }
 0xd01   :  { %v4514_v19 = vpop.eup %4513  ;;  %4519 = vrcp.f32 %v3685_v18 }
 0xd02   :  { %v4516_v6 = vpop.eup %4515  ;;  %v3688_v21 = vadd.f32 1.0, %v4514_v19 }
 0xd03   :  { %v3687_v5 = vadd.f32 1.0, %v4516_v6 }
 0xd04   :  { %4521 = vrcp.f32 %v3688_v21 }
 0xd05   :  { %4523 = vrcp.f32 %v3687_v5 }
 0xd0a   :  { %v4518_v22 = vpop.eup %4517 }
 0xd0b   :  { %v4520_v12 = vpop.eup %4519  ;;  %3698 = vst.msk [vmem:[%s3774_s16 + $0x8] sm:$0xff] %vm258_vm1, %v4518_v22 }
 0xd0c   :  { %3697 = vst.msk [vmem:[%s3774_s16] sm:$0xff] %vm258_vm1, %v4520_v12 }
 0xd0e   :  { %v4522_v11 = vpop.eup %4521 }
 0xd0f   :  { %v4524_v25 = vpop.eup %4523  ;;  %3700 = vst.msk [vmem:[%s3774_s16 + $0x18] sm:$0xff] %vm258_vm1, %v4522_v11 }
 0xd10   :  { %3699 = vst.msk [vmem:[%s3774_s16 + $0x10] sm:$0xff] %vm258_vm1, %v4524_v25 }

</bundles_post_ra>
